<compile_context>
chip_gen: v5e
topology: v5e:2x2
jax: 0.10.0
libtpu: 0.0.40
codegen_flags: <defaults>
</compile_context>

<pallas_src>
import functools
import numpy as np
import jax
import jax.numpy as jnp
from jax import lax
from jax.experimental import pallas as pl
from jax.experimental.pallas import tpu as pltpu


def _layernorm(x, gamma, beta, eps=1e-5):
    mu = jnp.mean(x, axis=-1, keepdims=True)
    var = jnp.mean((x - mu) * (x - mu), axis=-1, keepdims=True)
    return (x - mu) * jax.lax.rsqrt(var + eps) * gamma + beta


def _gtl_kernel(heads, bt,
                x_ref, db_ref, mb_ref,
                wqkv_ref, bqkv_ref, wo_ref, bo_ref,
                g1_ref, b1_ref, wf1_ref, bf1_ref, wf2_ref, bf2_ref,
                g2_ref, b2_ref,
                out_ref, attn_ref):
    n = x_ref.shape[1]
    e = x_ref.shape[2]
    d = e // heads
    bf16 = jnp.bfloat16
    f32 = jnp.float32

    x_slab = x_ref[...].reshape(bt * n, e)            # f32, kept for residual / LN
    x_bf = x_slab.astype(bf16)

    # ---- fused QKV projection: single lane-dense (bt*N, E) @ (E, 3E) matmul ----
    qkv = jnp.dot(x_bf, wqkv_ref[...], preferred_element_type=f32) + bqkv_ref[...]

    # ---- per-graph / per-head attention ----
    # heads and bt are small; static unroll keeps all lane/sublane slices static
    # (a fori_loop would force dynamic lane slicing of width d).  Per-head outputs
    # are written straight into the attn_ref slab, bounding live ranges.
    for b in range(bt):
        r0 = b * n
        db_b = db_ref[b].astype(f32)                   # (N, N): bf16 stream -> f32
        mb_b = jnp.broadcast_to(mb_ref[b], (n, n))     # hoisted: one broadcast per graph
        for h in range(heads):
            q_h = qkv[r0:r0 + n, h * d:(h + 1) * d]                    # scale folded in
            k_h = qkv[r0:r0 + n, e + h * d:e + (h + 1) * d]
            v_h = qkv[r0:r0 + n, 2 * e + h * d:2 * e + (h + 1) * d]

            # scores: q @ k^T (f32 accumulation, no explicit transpose)
            sc = lax.dot_general(q_h, k_h,
                                 dimension_numbers=(((1,), (1,)), ((), ())),
                                 preferred_element_type=f32)           # (N, N)
            sc = jnp.clip(sc + db_b, -10.0, 10.0) + mb_b               # mask after clip

            # softmax over keys (divide on EUP)
            mrow = jnp.max(sc, axis=-1, keepdims=True)
            p = jnp.exp(sc - mrow)
            a = p * pl.reciprocal(jnp.sum(p, axis=-1, keepdims=True), approx=True)

            oh = jnp.dot(a.astype(bf16), v_h.astype(bf16),
                         preferred_element_type=f32)                   # (N, d)
            # head output -> its lane offset of the (bt*N, E) slab
            attn_ref[r0:r0 + n, h * d:(h + 1) * d] = oh

    # ---- single out-projection + residual + LN + FFN + residual + LN on full slab ----
    h_att = jnp.dot(attn_ref[...].astype(bf16), wo_ref[...],
                    preferred_element_type=f32) + bo_ref[...]
    x1 = _layernorm(x_slab + h_att, g1_ref[...], b1_ref[...])

    f = jnp.dot(x1.astype(bf16), wf1_ref[...], preferred_element_type=f32) + bf1_ref[...]
    f = jnp.maximum(f, 0.0)
    h2 = jnp.dot(f.astype(bf16), wf2_ref[...], preferred_element_type=f32) + bf2_ref[...]

    out_ref[...] = _layernorm(x1 + h2, g2_ref[...], b2_ref[...]).reshape(bt, n, e)


def _pick_vmem_limit():
    """Per-generation scoped VMEM budget (96 MiB on 128-MiB chips, 32 MiB on v7x)."""
    phys = 64 * 1024 * 1024
    try:
        phys = int(pltpu.get_tpu_info().vmem_capacity_bytes)
    except Exception:
        pass
    if phys >= 128 * 1024 * 1024:          # v5e / v6e
        return 96 * 1024 * 1024
    return 32 * 1024 * 1024                # v7x-class (64 MiB physical)


def _pick_batch_block(B, N, E, vmem_limit):
    """Largest bt that (a) divides B, (b) keeps grid >= 2 steps, (c) fits VMEM."""
    if N > 512:                            # large graphs: one graph per step (pre flash-tiling)
        return 1
    max_bt = max(1, B // 2)                # keep >= 2 grid steps for v7x 2-TC sharding
    best = 1
    for bt in range(1, min(B, 8) + 1):
        if B % bt or bt > max_bt:
            continue
        io_block = bt * N * (E * 4         # x block, f32
                             + N * 2       # db block, bf16
                             + 4           # mask-bias row
                             + E * 4)      # out block, f32
        need = 2 * io_block + bt * N * E * 4    # double-buffered I/O + f32 attn scratch
        if need <= int(0.6 * vmem_limit):
            best = bt
    return best


def graph_transformer_layer(x, db, mask_f, params, heads, batch_block=None):
    B, N, E = x.shape
    d = E // heads
    scale = 1.0 / np.sqrt(d)
    bf16 = jnp.bfloat16
    f32 = jnp.float32

    vmem_limit = _pick_vmem_limit()
    bt = batch_block if batch_block is not None else _pick_batch_block(B, N, E, vmem_limit)

    # --- packed (E, 3E) QKV weights, scale folded into Q; weights in bf16 ---
    wqkv = jnp.concatenate([params["wq"] * scale, params["wk"], params["wv"]],
                           axis=-1).astype(bf16)                       # (E, 3E)
    bqkv = jnp.concatenate([params["bq"] * scale, params["bk"], params["bv"]],
                           axis=-1).astype(f32)                        # (1, 3E)
    wo = params["wo"].astype(bf16)
    wf1 = params["wf1"].astype(bf16)
    wf2 = params["wf2"].astype(bf16)

    # mask -> finite additive bias (0 valid / -1e9 masked); no -inf/NaN, no per-head selects
    mbias = (mask_f.astype(f32) - 1.0) * 1e9                           # (B, 1, N)

    param_list = [
        wqkv, bqkv, wo, params["bo"],
        params["g1"], params["b1"], wf1, params["bf1"],
        wf2, params["bf2"], params["g2"], params["b2"],
    ]

    data_specs = [
        pl.BlockSpec((bt, N, E), lambda i: (i, 0, 0)),   # x (f32)
        pl.BlockSpec((bt, N, N), lambda i: (i, 0, 0)),   # distance bias (bf16 stream)
        pl.BlockSpec((bt, 1, N), lambda i: (i, 0, 0)),   # mask bias (f32, tiny)
    ]

    kernel = functools.partial(_gtl_kernel, heads, bt)

    def build(single_buffer_weights):
        wkw = {"pipeline_mode": pl.Buffered(1)} if single_buffer_weights else {}
        w_specs = [pl.BlockSpec(p.shape, lambda i, nd=p.ndim: (0,) * nd, **wkw)
                   for p in param_list]
        return pl.pallas_call(
            kernel,
            out_shape=jax.ShapeDtypeStruct((B, N, E), f32),
            grid=(B // bt,),
            in_specs=data_specs + w_specs,
            out_specs=pl.BlockSpec((bt, N, E), lambda i: (i, 0, 0)),
            scratch_shapes=[pltpu.VMEM((bt * N, E), f32)],   # per-head attention slab
            compiler_params=pltpu.CompilerParams(
                dimension_semantics=("parallel",),           # batches -> 2 TCs on v7x
                vmem_limit_bytes=vmem_limit),
        )

    args = (x.astype(f32), db.astype(bf16), mbias, *param_list)
    # Weights never change block index -> request single buffering; fall back to the
    # default double-buffered specs if this JAX/Mosaic rejects Buffered(1).
    for single_buf in (True, False):
        try:
            return jax.block_until_ready(build(single_buf)(*args))
        except Exception:
            if not single_buf:
                raise


def _reference(x, db, mask_f, params, heads):
    """Pure-JAX f32 reference mirroring the PyTorch forward (eval mode)."""
    B, N, E = x.shape
    d = E // heads
    q = x @ params["wq"] + params["bq"]
    k = x @ params["wk"] + params["bk"]
    v = x @ params["wv"] + params["bv"]
    q = q.reshape(B, N, heads, d).transpose(0, 2, 1, 3)
    k = k.reshape(B, N, heads, d).transpose(0, 2, 1, 3)
    v = v.reshape(B, N, heads, d).transpose(0, 2, 1, 3)
    sc = jnp.einsum("bhnd,bhmd->bhnm", q, k) / np.sqrt(d) + db[:, None]
    sc = jnp.clip(sc, -10.0, 10.0)
    m = mask_f[:, :, None, :] > 0.5          # (B,1,1,N)
    sc = jnp.where(m, sc, -jnp.inf)
    a = jax.nn.softmax(sc, axis=-1)
    o = jnp.einsum("bhnm,bhmd->bhnd", a, v).transpose(0, 2, 1, 3).reshape(B, N, E)
    h = o @ params["wo"] + params["bo"]
    x1 = _layernorm(x + h, params["g1"], params["b1"])
    f = jnp.maximum(x1 @ params["wf1"] + params["bf1"], 0.0)
    h2 = f @ params["wf2"] + params["bf2"]
    return _layernorm(x1 + h2, params["g2"], params["b2"])


if __name__ == "__main__":
    B, N, E, heads = 2, 8, 32, 4

    key = jax.random.PRNGKey(0)
    keys = jax.random.split(key, 12)

    x = jax.random.normal(keys[0], (B, N, E), dtype=jnp.float32)
    db = 0.5 * jax.random.normal(keys[1], (B, N, N), dtype=jnp.float32)
    # mask: batch 0 fully valid, batch 1 has last two keys masked
    mask_np = np.ones((B, N), dtype=np.float32)
    mask_np[1, 6:] = 0.0
    mask_f = jnp.asarray(mask_np).reshape(B, 1, N)

    def lin_w(k, fan_in, fan_out):
        return 0.1 * jax.random.normal(k, (fan_in, fan_out), dtype=jnp.float32)

    params = {
        "wq": lin_w(keys[2], E, E),  "bq": jnp.zeros((1, E), jnp.float32),
        "wk": lin_w(keys[3], E, E),  "bk": jnp.zeros((1, E), jnp.float32),
        "wv": lin_w(keys[4], E, E),  "bv": jnp.zeros((1, E), jnp.float32),
        "wo": lin_w(keys[5], E, E),  "bo": 0.01 * jnp.ones((1, E), jnp.float32),
        "g1": jnp.ones((1, E), jnp.float32),  "b1": jnp.zeros((1, E), jnp.float32),
        "wf1": lin_w(keys[6], E, 2 * E), "bf1": jnp.zeros((1, 2 * E), jnp.float32),
        "wf2": lin_w(keys[7], 2 * E, E), "bf2": jnp.zeros((1, E), jnp.float32),
        "g2": jnp.ones((1, E), jnp.float32),  "b2": jnp.zeros((1, E), jnp.float32),
    }
    # TODO(synk): dropout in attention/FFN is identity (eval mode) by design.

    out = graph_transformer_layer(x, db, mask_f, params, heads)
    out = jax.block_until_ready(out)

    ref = _reference(x, db, mask_f, params, heads)
    np.testing.assert_allclose(np.asarray(out), np.asarray(ref),
                               rtol=2e-2, atol=2e-2)
    print("KERNEL_OK")
</pallas_src>

<mosaic_0001>
module attributes {stable_mosaic.version = 11 : i64} {
  func.func @_gtl_kernel(%arg0: i32, %arg1: memref<1x8x32xf32, #tpu.memory_space<vmem>>, %arg2: memref<1x8x8xbf16, #tpu.memory_space<vmem>>, %arg3: memref<1x1x8xf32, #tpu.memory_space<vmem>>, %arg4: memref<32x96xbf16, #tpu.memory_space<vmem>>, %arg5: memref<1x96xf32, #tpu.memory_space<vmem>>, %arg6: memref<32x32xbf16, #tpu.memory_space<vmem>>, %arg7: memref<1x32xf32, #tpu.memory_space<vmem>>, %arg8: memref<1x32xf32, #tpu.memory_space<vmem>>, %arg9: memref<1x32xf32, #tpu.memory_space<vmem>>, %arg10: memref<32x64xbf16, #tpu.memory_space<vmem>>, %arg11: memref<1x64xf32, #tpu.memory_space<vmem>>, %arg12: memref<64x32xbf16, #tpu.memory_space<vmem>>, %arg13: memref<1x32xf32, #tpu.memory_space<vmem>>, %arg14: memref<1x32xf32, #tpu.memory_space<vmem>>, %arg15: memref<1x32xf32, #tpu.memory_space<vmem>>, %arg16: memref<1x8x32xf32, #tpu.memory_space<vmem>>, %arg17: memref<8x32xf32, #tpu.memory_space<vmem>>) attributes {dimension_semantics = [#tpu.dimension_semantics<parallel>], iteration_bounds = array<i64: 2>, scalar_prefetch = 0 : i64, scratch_operands = 1 : i64, tpu.core_type = #tpu.core_type<tc>, window_params = [{transform_indices = @transform_0, window_bounds = array<i64: 1, 8, 32>}, {transform_indices = @transform_1, window_bounds = array<i64: 1, 8, 8>}, {transform_indices = @transform_2, window_bounds = array<i64: 1, 1, 8>}, {pipeline_mode = #tpu.pipeline_mode<synchronous>, transform_indices = @transform_3, window_bounds = array<i64: 32, 96>}, {pipeline_mode = #tpu.pipeline_mode<synchronous>, transform_indices = @transform_4, window_bounds = array<i64: 1, 96>}, {pipeline_mode = #tpu.pipeline_mode<synchronous>, transform_indices = @transform_5, window_bounds = array<i64: 32, 32>}, {pipeline_mode = #tpu.pipeline_mode<synchronous>, transform_indices = @transform_6, window_bounds = array<i64: 1, 32>}, {pipeline_mode = #tpu.pipeline_mode<synchronous>, transform_indices = @transform_7, window_bounds = array<i64: 1, 32>}, {pipeline_mode = #tpu.pipeline_mode<synchronous>, transform_indices = @transform_8, window_bounds = array<i64: 1, 32>}, {pipeline_mode = #tpu.pipeline_mode<synchronous>, transform_indices = @transform_9, window_bounds = array<i64: 32, 64>}, {pipeline_mode = #tpu.pipeline_mode<synchronous>, transform_indices = @transform_10, window_bounds = array<i64: 1, 64>}, {pipeline_mode = #tpu.pipeline_mode<synchronous>, transform_indices = @transform_11, window_bounds = array<i64: 64, 32>}, {pipeline_mode = #tpu.pipeline_mode<synchronous>, transform_indices = @transform_12, window_bounds = array<i64: 1, 32>}, {pipeline_mode = #tpu.pipeline_mode<synchronous>, transform_indices = @transform_13, window_bounds = array<i64: 1, 32>}, {pipeline_mode = #tpu.pipeline_mode<synchronous>, transform_indices = @transform_14, window_bounds = array<i64: 1, 32>}, {transform_indices = @transform_15, window_bounds = array<i64: 1, 8, 32>}]} {
    %c0 = arith.constant 0 : index
    %c0_0 = arith.constant 0 : index
    %c0_1 = arith.constant 0 : index
    %0 = vector.load %arg1[%c0, %c0_0, %c0_1] : memref<1x8x32xf32, #tpu.memory_space<vmem>>, vector<1x8x32xf32>
    %1 = vector.shape_cast %0 : vector<1x8x32xf32> to vector<8x32xf32>
    %2 = arith.truncf %1 : vector<8x32xf32> to vector<8x32xbf16>
    %c0_2 = arith.constant 0 : index
    %c0_3 = arith.constant 0 : index
    %3 = vector.load %arg4[%c0_2, %c0_3] : memref<32x96xbf16, #tpu.memory_space<vmem>>, vector<32x96xbf16>
    %cst = arith.constant dense<0.000000e+00> : vector<8x96xf32>
    %4 = tpu.matmul %2, %3, %cst {dimension_numbers = #tpu.dot_dimension_numbers<[1], [0], [0], [1], [0, 0, 1, 1], [], []>} : vector<8x32xbf16>, vector<32x96xbf16>, vector<8x96xf32> -> vector<8x96xf32>
    %c0_4 = arith.constant 0 : index
    %c0_5 = arith.constant 0 : index
    %5 = vector.load %arg5[%c0_4, %c0_5] : memref<1x96xf32, #tpu.memory_space<vmem>>, vector<1x96xf32>
    %6 = vector.broadcast %5 : vector<1x96xf32> to vector<8x96xf32>
    %7 = arith.addf %4, %6 : vector<8x96xf32>
    %c0_6 = arith.constant 0 : index
    %c0_7 = arith.constant 0 : index
    %c0_8 = arith.constant 0 : index
    %8 = vector.load %arg2[%c0_6, %c0_7, %c0_8] : memref<1x8x8xbf16, #tpu.memory_space<vmem>>, vector<1x8x8xbf16>
    %9 = vector.shape_cast %8 : vector<1x8x8xbf16> to vector<8x8xbf16>
    %10 = arith.extf %9 : vector<8x8xbf16> to vector<8x8xf32>
    %c0_9 = arith.constant 0 : index
    %c0_10 = arith.constant 0 : index
    %c0_11 = arith.constant 0 : index
    %11 = vector.load %arg3[%c0_9, %c0_10, %c0_11] : memref<1x1x8xf32, #tpu.memory_space<vmem>>, vector<1x1x8xf32>
    %12 = vector.shape_cast %11 : vector<1x1x8xf32> to vector<1x8xf32>
    %13 = vector.shape_cast %12 : vector<1x8xf32> to vector<1x8xf32>
    %14 = vector.broadcast %13 : vector<1x8xf32> to vector<8x8xf32>
    %15 = vector.extract_strided_slice %7 {offsets = [0, 0], sizes = [8, 8], strides = [1, 1]} : vector<8x96xf32> to vector<8x8xf32>
    %16 = vector.extract_strided_slice %7 {offsets = [0, 32], sizes = [8, 8], strides = [1, 1]} : vector<8x96xf32> to vector<8x8xf32>
    %17 = vector.extract_strided_slice %7 {offsets = [0, 64], sizes = [8, 8], strides = [1, 1]} : vector<8x96xf32> to vector<8x8xf32>
    %cst_12 = arith.constant dense<0.000000e+00> : vector<8x8xf32>
    %18 = tpu.matmul %15, %16, %cst_12 {dimension_numbers = #tpu.dot_dimension_numbers<[1], [1], [0], [0], [0, 0, 1, 0], [], []>} : vector<8x8xf32>, vector<8x8xf32>, vector<8x8xf32> -> vector<8x8xf32>
    %19 = arith.addf %18, %10 : vector<8x8xf32>
    %cst_13 = arith.constant -1.000000e+01 : f32
    %cst_14 = arith.constant 1.000000e+01 : f32
    %20 = vector.broadcast %cst_13 : f32 to vector<8x8xf32>
    %21 = arith.maximumf %20, %19 : vector<8x8xf32>
    %22 = vector.broadcast %cst_14 : f32 to vector<8x8xf32>
    %23 = arith.minimumf %22, %21 : vector<8x8xf32>
    %24 = arith.addf %23, %14 : vector<8x8xf32>
    %cst_15 = arith.constant dense<0xFF800000> : vector<8xf32>
    %25 = vector.multi_reduction <maximumf>, %24, %cst_15 [1] : vector<8x8xf32> to vector<8xf32>
    %26 = vector.shape_cast %25 : vector<8xf32> to vector<8x1xf32>
    %27 = vector.broadcast %26 : vector<8x1xf32> to vector<8x8xf32>
    %28 = arith.subf %24, %27 : vector<8x8xf32>
    %29 = math.exp %28 : vector<8x8xf32>
    %cst_16 = arith.constant dense<0.000000e+00> : vector<8xf32>
    %30 = vector.multi_reduction <add>, %29, %cst_16 [1] : vector<8x8xf32> to vector<8xf32>
    %31 = vector.shape_cast %30 : vector<8xf32> to vector<8x1xf32>
    %32 = tpu.reciprocal %31 {approx = true} : vector<8x1xf32> -> vector<8x1xf32>
    %33 = vector.broadcast %32 : vector<8x1xf32> to vector<8x8xf32>
    %34 = arith.mulf %29, %33 : vector<8x8xf32>
    %35 = arith.truncf %34 : vector<8x8xf32> to vector<8x8xbf16>
    %36 = arith.truncf %17 : vector<8x8xf32> to vector<8x8xbf16>
    %cst_17 = arith.constant dense<0.000000e+00> : vector<8x8xf32>
    %37 = tpu.matmul %35, %36, %cst_17 {dimension_numbers = #tpu.dot_dimension_numbers<[1], [0], [0], [1], [0, 0, 1, 1], [], []>} : vector<8x8xbf16>, vector<8x8xbf16>, vector<8x8xf32> -> vector<8x8xf32>
    %c0_18 = arith.constant 0 : index
    %c0_19 = arith.constant 0 : index
    %38 = vector.load %arg17[%c0_18, %c0_19] : memref<8x32xf32, #tpu.memory_space<vmem>>, vector<8x8xf32>
    tpu.vector_store %arg17[%c0_18, %c0_19], %37 {strides = array<i32>} : memref<8x32xf32, #tpu.memory_space<vmem>>, vector<8x8xf32>,
    %39 = vector.extract_strided_slice %7 {offsets = [0, 8], sizes = [8, 8], strides = [1, 1]} : vector<8x96xf32> to vector<8x8xf32>
    %40 = vector.extract_strided_slice %7 {offsets = [0, 40], sizes = [8, 8], strides = [1, 1]} : vector<8x96xf32> to vector<8x8xf32>
    %41 = vector.extract_strided_slice %7 {offsets = [0, 72], sizes = [8, 8], strides = [1, 1]} : vector<8x96xf32> to vector<8x8xf32>
    %cst_20 = arith.constant dense<0.000000e+00> : vector<8x8xf32>
    %42 = tpu.matmul %39, %40, %cst_20 {dimension_numbers = #tpu.dot_dimension_numbers<[1], [1], [0], [0], [0, 0, 1, 0], [], []>} : vector<8x8xf32>, vector<8x8xf32>, vector<8x8xf32> -> vector<8x8xf32>
    %43 = arith.addf %42, %10 : vector<8x8xf32>
    %cst_21 = arith.constant -1.000000e+01 : f32
    %cst_22 = arith.constant 1.000000e+01 : f32
    %44 = vector.broadcast %cst_21 : f32 to vector<8x8xf32>
    %45 = arith.maximumf %44, %43 : vector<8x8xf32>
    %46 = vector.broadcast %cst_22 : f32 to vector<8x8xf32>
    %47 = arith.minimumf %46, %45 : vector<8x8xf32>
    %48 = arith.addf %47, %14 : vector<8x8xf32>
    %cst_23 = arith.constant dense<0xFF800000> : vector<8xf32>
    %49 = vector.multi_reduction <maximumf>, %48, %cst_23 [1] : vector<8x8xf32> to vector<8xf32>
    %50 = vector.shape_cast %49 : vector<8xf32> to vector<8x1xf32>
    %51 = vector.broadcast %50 : vector<8x1xf32> to vector<8x8xf32>
    %52 = arith.subf %48, %51 : vector<8x8xf32>
    %53 = math.exp %52 : vector<8x8xf32>
    %cst_24 = arith.constant dense<0.000000e+00> : vector<8xf32>
    %54 = vector.multi_reduction <add>, %53, %cst_24 [1] : vector<8x8xf32> to vector<8xf32>
    %55 = vector.shape_cast %54 : vector<8xf32> to vector<8x1xf32>
    %56 = tpu.reciprocal %55 {approx = true} : vector<8x1xf32> -> vector<8x1xf32>
    %57 = vector.broadcast %56 : vector<8x1xf32> to vector<8x8xf32>
    %58 = arith.mulf %53, %57 : vector<8x8xf32>
    %59 = arith.truncf %58 : vector<8x8xf32> to vector<8x8xbf16>
    %60 = arith.truncf %41 : vector<8x8xf32> to vector<8x8xbf16>
    %cst_25 = arith.constant dense<0.000000e+00> : vector<8x8xf32>
    %61 = tpu.matmul %59, %60, %cst_25 {dimension_numbers = #tpu.dot_dimension_numbers<[1], [0], [0], [1], [0, 0, 1, 1], [], []>} : vector<8x8xbf16>, vector<8x8xbf16>, vector<8x8xf32> -> vector<8x8xf32>
    %c0_26 = arith.constant 0 : index
    %c8 = arith.constant 8 : index
    %62 = vector.load %arg17[%c0_26, %c8] : memref<8x32xf32, #tpu.memory_space<vmem>>, vector<8x8xf32>
    tpu.vector_store %arg17[%c0_26, %c8], %61 {strides = array<i32>} : memref<8x32xf32, #tpu.memory_space<vmem>>, vector<8x8xf32>,
    %63 = vector.extract_strided_slice %7 {offsets = [0, 16], sizes = [8, 8], strides = [1, 1]} : vector<8x96xf32> to vector<8x8xf32>
    %64 = vector.extract_strided_slice %7 {offsets = [0, 48], sizes = [8, 8], strides = [1, 1]} : vector<8x96xf32> to vector<8x8xf32>
    %65 = vector.extract_strided_slice %7 {offsets = [0, 80], sizes = [8, 8], strides = [1, 1]} : vector<8x96xf32> to vector<8x8xf32>
    %cst_27 = arith.constant dense<0.000000e+00> : vector<8x8xf32>
    %66 = tpu.matmul %63, %64, %cst_27 {dimension_numbers = #tpu.dot_dimension_numbers<[1], [1], [0], [0], [0, 0, 1, 0], [], []>} : vector<8x8xf32>, vector<8x8xf32>, vector<8x8xf32> -> vector<8x8xf32>
    %67 = arith.addf %66, %10 : vector<8x8xf32>
    %cst_28 = arith.constant -1.000000e+01 : f32
    %cst_29 = arith.constant 1.000000e+01 : f32
    %68 = vector.broadcast %cst_28 : f32 to vector<8x8xf32>
    %69 = arith.maximumf %68, %67 : vector<8x8xf32>
    %70 = vector.broadcast %cst_29 : f32 to vector<8x8xf32>
    %71 = arith.minimumf %70, %69 : vector<8x8xf32>
    %72 = arith.addf %71, %14 : vector<8x8xf32>
    %cst_30 = arith.constant dense<0xFF800000> : vector<8xf32>
    %73 = vector.multi_reduction <maximumf>, %72, %cst_30 [1] : vector<8x8xf32> to vector<8xf32>
    %74 = vector.shape_cast %73 : vector<8xf32> to vector<8x1xf32>
    %75 = vector.broadcast %74 : vector<8x1xf32> to vector<8x8xf32>
    %76 = arith.subf %72, %75 : vector<8x8xf32>
    %77 = math.exp %76 : vector<8x8xf32>
    %cst_31 = arith.constant dense<0.000000e+00> : vector<8xf32>
    %78 = vector.multi_reduction <add>, %77, %cst_31 [1] : vector<8x8xf32> to vector<8xf32>
    %79 = vector.shape_cast %78 : vector<8xf32> to vector<8x1xf32>
    %80 = tpu.reciprocal %79 {approx = true} : vector<8x1xf32> -> vector<8x1xf32>
    %81 = vector.broadcast %80 : vector<8x1xf32> to vector<8x8xf32>
    %82 = arith.mulf %77, %81 : vector<8x8xf32>
    %83 = arith.truncf %82 : vector<8x8xf32> to vector<8x8xbf16>
    %84 = arith.truncf %65 : vector<8x8xf32> to vector<8x8xbf16>
    %cst_32 = arith.constant dense<0.000000e+00> : vector<8x8xf32>
    %85 = tpu.matmul %83, %84, %cst_32 {dimension_numbers = #tpu.dot_dimension_numbers<[1], [0], [0], [1], [0, 0, 1, 1], [], []>} : vector<8x8xbf16>, vector<8x8xbf16>, vector<8x8xf32> -> vector<8x8xf32>
    %c0_33 = arith.constant 0 : index
    %c16 = arith.constant 16 : index
    %86 = vector.load %arg17[%c0_33, %c16] : memref<8x32xf32, #tpu.memory_space<vmem>>, vector<8x8xf32>
    tpu.vector_store %arg17[%c0_33, %c16], %85 {strides = array<i32>} : memref<8x32xf32, #tpu.memory_space<vmem>>, vector<8x8xf32>,
    %87 = vector.extract_strided_slice %7 {offsets = [0, 24], sizes = [8, 8], strides = [1, 1]} : vector<8x96xf32> to vector<8x8xf32>
    %88 = vector.extract_strided_slice %7 {offsets = [0, 56], sizes = [8, 8], strides = [1, 1]} : vector<8x96xf32> to vector<8x8xf32>
    %89 = vector.extract_strided_slice %7 {offsets = [0, 88], sizes = [8, 8], strides = [1, 1]} : vector<8x96xf32> to vector<8x8xf32>
    %cst_34 = arith.constant dense<0.000000e+00> : vector<8x8xf32>
    %90 = tpu.matmul %87, %88, %cst_34 {dimension_numbers = #tpu.dot_dimension_numbers<[1], [1], [0], [0], [0, 0, 1, 0], [], []>} : vector<8x8xf32>, vector<8x8xf32>, vector<8x8xf32> -> vector<8x8xf32>
    %91 = arith.addf %90, %10 : vector<8x8xf32>
    %cst_35 = arith.constant -1.000000e+01 : f32
    %cst_36 = arith.constant 1.000000e+01 : f32
    %92 = vector.broadcast %cst_35 : f32 to vector<8x8xf32>
    %93 = arith.maximumf %92, %91 : vector<8x8xf32>
    %94 = vector.broadcast %cst_36 : f32 to vector<8x8xf32>
    %95 = arith.minimumf %94, %93 : vector<8x8xf32>
    %96 = arith.addf %95, %14 : vector<8x8xf32>
    %cst_37 = arith.constant dense<0xFF800000> : vector<8xf32>
    %97 = vector.multi_reduction <maximumf>, %96, %cst_37 [1] : vector<8x8xf32> to vector<8xf32>
    %98 = vector.shape_cast %97 : vector<8xf32> to vector<8x1xf32>
    %99 = vector.broadcast %98 : vector<8x1xf32> to vector<8x8xf32>
    %100 = arith.subf %96, %99 : vector<8x8xf32>
    %101 = math.exp %100 : vector<8x8xf32>
    %cst_38 = arith.constant dense<0.000000e+00> : vector<8xf32>
    %102 = vector.multi_reduction <add>, %101, %cst_38 [1] : vector<8x8xf32> to vector<8xf32>
    %103 = vector.shape_cast %102 : vector<8xf32> to vector<8x1xf32>
    %104 = tpu.reciprocal %103 {approx = true} : vector<8x1xf32> -> vector<8x1xf32>
    %105 = vector.broadcast %104 : vector<8x1xf32> to vector<8x8xf32>
    %106 = arith.mulf %101, %105 : vector<8x8xf32>
    %107 = arith.truncf %106 : vector<8x8xf32> to vector<8x8xbf16>
    %108 = arith.truncf %89 : vector<8x8xf32> to vector<8x8xbf16>
    %cst_39 = arith.constant dense<0.000000e+00> : vector<8x8xf32>
    %109 = tpu.matmul %107, %108, %cst_39 {dimension_numbers = #tpu.dot_dimension_numbers<[1], [0], [0], [1], [0, 0, 1, 1], [], []>} : vector<8x8xbf16>, vector<8x8xbf16>, vector<8x8xf32> -> vector<8x8xf32>
    %c0_40 = arith.constant 0 : index
    %c24 = arith.constant 24 : index
    %110 = vector.load %arg17[%c0_40, %c24] : memref<8x32xf32, #tpu.memory_space<vmem>>, vector<8x8xf32>
    tpu.vector_store %arg17[%c0_40, %c24], %109 {strides = array<i32>} : memref<8x32xf32, #tpu.memory_space<vmem>>, vector<8x8xf32>,
    %c0_41 = arith.constant 0 : index
    %c0_42 = arith.constant 0 : index
    %111 = vector.load %arg17[%c0_41, %c0_42] : memref<8x32xf32, #tpu.memory_space<vmem>>, vector<8x32xf32>
    %112 = arith.truncf %111 : vector<8x32xf32> to vector<8x32xbf16>
    %c0_43 = arith.constant 0 : index
    %c0_44 = arith.constant 0 : index
    %113 = vector.load %arg6[%c0_43, %c0_44] : memref<32x32xbf16, #tpu.memory_space<vmem>>, vector<32x32xbf16>
    %cst_45 = arith.constant dense<0.000000e+00> : vector<8x32xf32>
    %114 = tpu.matmul %112, %113, %cst_45 {dimension_numbers = #tpu.dot_dimension_numbers<[1], [0], [0], [1], [0, 0, 1, 1], [], []>} : vector<8x32xbf16>, vector<32x32xbf16>, vector<8x32xf32> -> vector<8x32xf32>
    %c0_46 = arith.constant 0 : index
    %c0_47 = arith.constant 0 : index
    %115 = vector.load %arg7[%c0_46, %c0_47] : memref<1x32xf32, #tpu.memory_space<vmem>>, vector<1x32xf32>
    %116 = vector.broadcast %115 : vector<1x32xf32> to vector<8x32xf32>
    %117 = arith.addf %114, %116 : vector<8x32xf32>
    %118 = arith.addf %1, %117 : vector<8x32xf32>
    %c0_48 = arith.constant 0 : index
    %c0_49 = arith.constant 0 : index
    %119 = vector.load %arg8[%c0_48, %c0_49] : memref<1x32xf32, #tpu.memory_space<vmem>>, vector<1x32xf32>
    %c0_50 = arith.constant 0 : index
    %c0_51 = arith.constant 0 : index
    %120 = vector.load %arg9[%c0_50, %c0_51] : memref<1x32xf32, #tpu.memory_space<vmem>>, vector<1x32xf32>
    %cst_52 = arith.constant dense<0.000000e+00> : vector<8xf32>
    %121 = vector.multi_reduction <add>, %118, %cst_52 [1] : vector<8x32xf32> to vector<8xf32>
    %122 = vector.shape_cast %121 : vector<8xf32> to vector<8x1xf32>
    %cst_53 = arith.constant 3.200000e+01 : f32
    %123 = vector.broadcast %cst_53 : f32 to vector<8x1xf32>
    %124 = arith.divf %122, %123 : vector<8x1xf32>
    %125 = vector.broadcast %124 : vector<8x1xf32> to vector<8x32xf32>
    %126 = arith.subf %118, %125 : vector<8x32xf32>
    %127 = vector.broadcast %124 : vector<8x1xf32> to vector<8x32xf32>
    %128 = arith.subf %118, %127 : vector<8x32xf32>
    %129 = arith.mulf %126, %128 : vector<8x32xf32>
    %cst_54 = arith.constant dense<0.000000e+00> : vector<8xf32>
    %130 = vector.multi_reduction <add>, %129, %cst_54 [1] : vector<8x32xf32> to vector<8xf32>
    %131 = vector.shape_cast %130 : vector<8xf32> to vector<8x1xf32>
    %cst_55 = arith.constant 3.200000e+01 : f32
    %132 = vector.broadcast %cst_55 : f32 to vector<8x1xf32>
    %133 = arith.divf %131, %132 : vector<8x1xf32>
    %134 = vector.broadcast %124 : vector<8x1xf32> to vector<8x32xf32>
    %135 = arith.subf %118, %134 : vector<8x32xf32>
    %cst_56 = arith.constant 9.99999974E-6 : f32
    %136 = vector.broadcast %cst_56 : f32 to vector<8x1xf32>
    %137 = arith.addf %133, %136 : vector<8x1xf32>
    %138 = math.rsqrt %137 : vector<8x1xf32>
    %139 = vector.broadcast %138 : vector<8x1xf32> to vector<8x32xf32>
    %140 = arith.mulf %135, %139 : vector<8x32xf32>
    %141 = vector.broadcast %119 : vector<1x32xf32> to vector<8x32xf32>
    %142 = arith.mulf %140, %141 : vector<8x32xf32>
    %143 = vector.broadcast %120 : vector<1x32xf32> to vector<8x32xf32>
    %144 = arith.addf %142, %143 : vector<8x32xf32>
    %145 = arith.truncf %144 : vector<8x32xf32> to vector<8x32xbf16>
    %c0_57 = arith.constant 0 : index
    %c0_58 = arith.constant 0 : index
    %146 = vector.load %arg10[%c0_57, %c0_58] : memref<32x64xbf16, #tpu.memory_space<vmem>>, vector<32x64xbf16>
    %cst_59 = arith.constant dense<0.000000e+00> : vector<8x64xf32>
    %147 = tpu.matmul %145, %146, %cst_59 {dimension_numbers = #tpu.dot_dimension_numbers<[1], [0], [0], [1], [0, 0, 1, 1], [], []>} : vector<8x32xbf16>, vector<32x64xbf16>, vector<8x64xf32> -> vector<8x64xf32>
    %c0_60 = arith.constant 0 : index
    %c0_61 = arith.constant 0 : index
    %148 = vector.load %arg11[%c0_60, %c0_61] : memref<1x64xf32, #tpu.memory_space<vmem>>, vector<1x64xf32>
    %149 = vector.broadcast %148 : vector<1x64xf32> to vector<8x64xf32>
    %150 = arith.addf %147, %149 : vector<8x64xf32>
    %cst_62 = arith.constant 0.000000e+00 : f32
    %151 = vector.broadcast %cst_62 : f32 to vector<8x64xf32>
    %152 = arith.maximumf %150, %151 : vector<8x64xf32>
    %153 = arith.truncf %152 : vector<8x64xf32> to vector<8x64xbf16>
    %c0_63 = arith.constant 0 : index
    %c0_64 = arith.constant 0 : index
    %154 = vector.load %arg12[%c0_63, %c0_64] : memref<64x32xbf16, #tpu.memory_space<vmem>>, vector<64x32xbf16>
    %cst_65 = arith.constant dense<0.000000e+00> : vector<8x32xf32>
    %155 = tpu.matmul %153, %154, %cst_65 {dimension_numbers = #tpu.dot_dimension_numbers<[1], [0], [0], [1], [0, 0, 1, 1], [], []>} : vector<8x64xbf16>, vector<64x32xbf16>, vector<8x32xf32> -> vector<8x32xf32>
    %c0_66 = arith.constant 0 : index
    %c0_67 = arith.constant 0 : index
    %156 = vector.load %arg13[%c0_66, %c0_67] : memref<1x32xf32, #tpu.memory_space<vmem>>, vector<1x32xf32>
    %157 = vector.broadcast %156 : vector<1x32xf32> to vector<8x32xf32>
    %158 = arith.addf %155, %157 : vector<8x32xf32>
    %159 = arith.addf %144, %158 : vector<8x32xf32>
    %c0_68 = arith.constant 0 : index
    %c0_69 = arith.constant 0 : index
    %160 = vector.load %arg14[%c0_68, %c0_69] : memref<1x32xf32, #tpu.memory_space<vmem>>, vector<1x32xf32>
    %c0_70 = arith.constant 0 : index
    %c0_71 = arith.constant 0 : index
    %161 = vector.load %arg15[%c0_70, %c0_71] : memref<1x32xf32, #tpu.memory_space<vmem>>, vector<1x32xf32>
    %cst_72 = arith.constant dense<0.000000e+00> : vector<8xf32>
    %162 = vector.multi_reduction <add>, %159, %cst_72 [1] : vector<8x32xf32> to vector<8xf32>
    %163 = vector.shape_cast %162 : vector<8xf32> to vector<8x1xf32>
    %cst_73 = arith.constant 3.200000e+01 : f32
    %164 = vector.broadcast %cst_73 : f32 to vector<8x1xf32>
    %165 = arith.divf %163, %164 : vector<8x1xf32>
    %166 = vector.broadcast %165 : vector<8x1xf32> to vector<8x32xf32>
    %167 = arith.subf %159, %166 : vector<8x32xf32>
    %168 = vector.broadcast %165 : vector<8x1xf32> to vector<8x32xf32>
    %169 = arith.subf %159, %168 : vector<8x32xf32>
    %170 = arith.mulf %167, %169 : vector<8x32xf32>
    %cst_74 = arith.constant dense<0.000000e+00> : vector<8xf32>
    %171 = vector.multi_reduction <add>, %170, %cst_74 [1] : vector<8x32xf32> to vector<8xf32>
    %172 = vector.shape_cast %171 : vector<8xf32> to vector<8x1xf32>
    %cst_75 = arith.constant 3.200000e+01 : f32
    %173 = vector.broadcast %cst_75 : f32 to vector<8x1xf32>
    %174 = arith.divf %172, %173 : vector<8x1xf32>
    %175 = vector.broadcast %165 : vector<8x1xf32> to vector<8x32xf32>
    %176 = arith.subf %159, %175 : vector<8x32xf32>
    %cst_76 = arith.constant 9.99999974E-6 : f32
    %177 = vector.broadcast %cst_76 : f32 to vector<8x1xf32>
    %178 = arith.addf %174, %177 : vector<8x1xf32>
    %179 = math.rsqrt %178 : vector<8x1xf32>
    %180 = vector.broadcast %179 : vector<8x1xf32> to vector<8x32xf32>
    %181 = arith.mulf %176, %180 : vector<8x32xf32>
    %182 = vector.broadcast %160 : vector<1x32xf32> to vector<8x32xf32>
    %183 = arith.mulf %181, %182 : vector<8x32xf32>
    %184 = vector.broadcast %161 : vector<1x32xf32> to vector<8x32xf32>
    %185 = arith.addf %183, %184 : vector<8x32xf32>
    %186 = vector.shape_cast %185 : vector<8x32xf32> to vector<1x8x32xf32>
    %c0_77 = arith.constant 0 : index
    %c0_78 = arith.constant 0 : index
    %c0_79 = arith.constant 0 : index
    %187 = vector.load %arg16[%c0_77, %c0_78, %c0_79] : memref<1x8x32xf32, #tpu.memory_space<vmem>>, vector<1x8x32xf32>
    tpu.vector_store %arg16[%c0_77, %c0_78, %c0_79], %186 {strides = array<i32>} : memref<1x8x32xf32, #tpu.memory_space<vmem>>, vector<1x8x32xf32>,
    return
  }
  func.func @transform_0(%arg0: i32) -> (i32, i32, i32) {
    %c0_i32 = arith.constant 0 : i32
    %c0_i32_0 = arith.constant 0 : i32
    %c0_i32_1 = arith.constant 0 : i32
    return %arg0, %c0_i32, %c0_i32_0 : i32, i32, i32
  }
  func.func @transform_1(%arg0: i32) -> (i32, i32, i32) {
    %c0_i32 = arith.constant 0 : i32
    %c0_i32_0 = arith.constant 0 : i32
    %c0_i32_1 = arith.constant 0 : i32
    return %arg0, %c0_i32, %c0_i32_0 : i32, i32, i32
  }
  func.func @transform_2(%arg0: i32) -> (i32, i32, i32) {
    %c0_i32 = arith.constant 0 : i32
    %c0_i32_0 = arith.constant 0 : i32
    %c0_i32_1 = arith.constant 0 : i32
    return %arg0, %c0_i32, %c0_i32_0 : i32, i32, i32
  }
  func.func @transform_3(%arg0: i32) -> (i32, i32) {
    %c0_i32 = arith.constant 0 : i32
    %c0_i32_0 = arith.constant 0 : i32
    %c0_i32_1 = arith.constant 0 : i32
    return %c0_i32, %c0_i32_0 : i32, i32
  }
  func.func @transform_4(%arg0: i32) -> (i32, i32) {
    %c0_i32 = arith.constant 0 : i32
    %c0_i32_0 = arith.constant 0 : i32
    %c0_i32_1 = arith.constant 0 : i32
    return %c0_i32, %c0_i32_0 : i32, i32
  }
  func.func @transform_5(%arg0: i32) -> (i32, i32) {
    %c0_i32 = arith.constant 0 : i32
    %c0_i32_0 = arith.constant 0 : i32
    %c0_i32_1 = arith.constant 0 : i32
    return %c0_i32, %c0_i32_0 : i32, i32
  }
  func.func @transform_6(%arg0: i32) -> (i32, i32) {
    %c0_i32 = arith.constant 0 : i32
    %c0_i32_0 = arith.constant 0 : i32
    %c0_i32_1 = arith.constant 0 : i32
    return %c0_i32, %c0_i32_0 : i32, i32
  }
  func.func @transform_7(%arg0: i32) -> (i32, i32) {
    %c0_i32 = arith.constant 0 : i32
    %c0_i32_0 = arith.constant 0 : i32
    %c0_i32_1 = arith.constant 0 : i32
    return %c0_i32, %c0_i32_0 : i32, i32
  }
  func.func @transform_8(%arg0: i32) -> (i32, i32) {
    %c0_i32 = arith.constant 0 : i32
    %c0_i32_0 = arith.constant 0 : i32
    %c0_i32_1 = arith.constant 0 : i32
    return %c0_i32, %c0_i32_0 : i32, i32
  }
  func.func @transform_9(%arg0: i32) -> (i32, i32) {
    %c0_i32 = arith.constant 0 : i32
    %c0_i32_0 = arith.constant 0 : i32
    %c0_i32_1 = arith.constant 0 : i32
    return %c0_i32, %c0_i32_0 : i32, i32
  }
  func.func @transform_10(%arg0: i32) -> (i32, i32) {
    %c0_i32 = arith.constant 0 : i32
    %c0_i32_0 = arith.constant 0 : i32
    %c0_i32_1 = arith.constant 0 : i32
    return %c0_i32, %c0_i32_0 : i32, i32
  }
  func.func @transform_11(%arg0: i32) -> (i32, i32) {
    %c0_i32 = arith.constant 0 : i32
    %c0_i32_0 = arith.constant 0 : i32
    %c0_i32_1 = arith.constant 0 : i32
    return %c0_i32, %c0_i32_0 : i32, i32
  }
  func.func @transform_12(%arg0: i32) -> (i32, i32) {
    %c0_i32 = arith.constant 0 : i32
    %c0_i32_0 = arith.constant 0 : i32
    %c0_i32_1 = arith.constant 0 : i32
    return %c0_i32, %c0_i32_0 : i32, i32
  }
  func.func @transform_13(%arg0: i32) -> (i32, i32) {
    %c0_i32 = arith.constant 0 : i32
    %c0_i32_0 = arith.constant 0 : i32
    %c0_i32_1 = arith.constant 0 : i32
    return %c0_i32, %c0_i32_0 : i32, i32
  }
  func.func @transform_14(%arg0: i32) -> (i32, i32) {
    %c0_i32 = arith.constant 0 : i32
    %c0_i32_0 = arith.constant 0 : i32
    %c0_i32_1 = arith.constant 0 : i32
    return %c0_i32, %c0_i32_0 : i32, i32
  }
  func.func @transform_15(%arg0: i32) -> (i32, i32, i32) {
    %c0_i32 = arith.constant 0 : i32
    %c0_i32_0 = arith.constant 0 : i32
    %c0_i32_1 = arith.constant 0 : i32
    return %arg0, %c0_i32, %c0_i32_0 : i32, i32, i32
  }
}

module attributes {stable_mosaic.version = 11 : i64} {
  func.func @_gtl_kernel(%arg0: i32, %arg1: memref<1x8x32xf32, #tpu.memory_space<vmem>>, %arg2: memref<1x8x8xbf16, #tpu.memory_space<vmem>>, %arg3: memref<1x1x8xf32, #tpu.memory_space<vmem>>, %arg4: memref<32x96xbf16, #tpu.memory_space<vmem>>, %arg5: memref<1x96xf32, #tpu.memory_space<vmem>>, %arg6: memref<32x32xbf16, #tpu.memory_space<vmem>>, %arg7: memref<1x32xf32, #tpu.memory_space<vmem>>, %arg8: memref<1x32xf32, #tpu.memory_space<vmem>>, %arg9: memref<1x32xf32, #tpu.memory_space<vmem>>, %arg10: memref<32x64xbf16, #tpu.memory_space<vmem>>, %arg11: memref<1x64xf32, #tpu.memory_space<vmem>>, %arg12: memref<64x32xbf16, #tpu.memory_space<vmem>>, %arg13: memref<1x32xf32, #tpu.memory_space<vmem>>, %arg14: memref<1x32xf32, #tpu.memory_space<vmem>>, %arg15: memref<1x32xf32, #tpu.memory_space<vmem>>, %arg16: memref<1x8x32xf32, #tpu.memory_space<vmem>>, %arg17: memref<8x32xf32, #tpu.memory_space<vmem>>) attributes {dimension_semantics = [#tpu.dimension_semantics<parallel>], iteration_bounds = array<i64: 2>, scalar_prefetch = 0 : i64, scratch_operands = 1 : i64, tpu.core_type = #tpu.core_type<tc>, window_params = [{transform_indices = @transform_0, window_bounds = array<i64: 1, 8, 32>}, {transform_indices = @transform_1, window_bounds = array<i64: 1, 8, 8>}, {transform_indices = @transform_2, window_bounds = array<i64: 1, 1, 8>}, {pipeline_mode = #tpu.pipeline_mode<synchronous>, transform_indices = @transform_3, window_bounds = array<i64: 32, 96>}, {pipeline_mode = #tpu.pipeline_mode<synchronous>, transform_indices = @transform_4, window_bounds = array<i64: 1, 96>}, {pipeline_mode = #tpu.pipeline_mode<synchronous>, transform_indices = @transform_5, window_bounds = array<i64: 32, 32>}, {pipeline_mode = #tpu.pipeline_mode<synchronous>, transform_indices = @transform_6, window_bounds = array<i64: 1, 32>}, {pipeline_mode = #tpu.pipeline_mode<synchronous>, transform_indices = @transform_7, window_bounds = array<i64: 1, 32>}, {pipeline_mode = #tpu.pipeline_mode<synchronous>, transform_indices = @transform_8, window_bounds = array<i64: 1, 32>}, {pipeline_mode = #tpu.pipeline_mode<synchronous>, transform_indices = @transform_9, window_bounds = array<i64: 32, 64>}, {pipeline_mode = #tpu.pipeline_mode<synchronous>, transform_indices = @transform_10, window_bounds = array<i64: 1, 64>}, {pipeline_mode = #tpu.pipeline_mode<synchronous>, transform_indices = @transform_11, window_bounds = array<i64: 64, 32>}, {pipeline_mode = #tpu.pipeline_mode<synchronous>, transform_indices = @transform_12, window_bounds = array<i64: 1, 32>}, {pipeline_mode = #tpu.pipeline_mode<synchronous>, transform_indices = @transform_13, window_bounds = array<i64: 1, 32>}, {pipeline_mode = #tpu.pipeline_mode<synchronous>, transform_indices = @transform_14, window_bounds = array<i64: 1, 32>}, {transform_indices = @transform_15, window_bounds = array<i64: 1, 8, 32>}]} {
    %c0 = arith.constant 0 : index
    %c0_0 = arith.constant 0 : index
    %c0_1 = arith.constant 0 : index
    %0 = vector.load %arg1[%c0, %c0_0, %c0_1] : memref<1x8x32xf32, #tpu.memory_space<vmem>>, vector<1x8x32xf32>
    %1 = vector.shape_cast %0 : vector<1x8x32xf32> to vector<8x32xf32>
    %2 = arith.truncf %1 : vector<8x32xf32> to vector<8x32xbf16>
    %c0_2 = arith.constant 0 : index
    %c0_3 = arith.constant 0 : index
    %3 = vector.load %arg4[%c0_2, %c0_3] : memref<32x96xbf16, #tpu.memory_space<vmem>>, vector<32x96xbf16>
    %cst = arith.constant dense<0.000000e+00> : vector<8x96xf32>
    %4 = tpu.matmul %2, %3, %cst {dimension_numbers = #tpu.dot_dimension_numbers<[1], [0], [0], [1], [0, 0, 1, 1], [], []>} : vector<8x32xbf16>, vector<32x96xbf16>, vector<8x96xf32> -> vector<8x96xf32>
    %c0_4 = arith.constant 0 : index
    %c0_5 = arith.constant 0 : index
    %5 = vector.load %arg5[%c0_4, %c0_5] : memref<1x96xf32, #tpu.memory_space<vmem>>, vector<1x96xf32>
    %6 = vector.broadcast %5 : vector<1x96xf32> to vector<8x96xf32>
    %7 = arith.addf %4, %6 : vector<8x96xf32>
    %c0_6 = arith.constant 0 : index
    %c0_7 = arith.constant 0 : index
    %c0_8 = arith.constant 0 : index
    %8 = vector.load %arg2[%c0_6, %c0_7, %c0_8] : memref<1x8x8xbf16, #tpu.memory_space<vmem>>, vector<1x8x8xbf16>
    %9 = vector.shape_cast %8 : vector<1x8x8xbf16> to vector<8x8xbf16>
    %10 = arith.extf %9 : vector<8x8xbf16> to vector<8x8xf32>
    %c0_9 = arith.constant 0 : index
    %c0_10 = arith.constant 0 : index
    %c0_11 = arith.constant 0 : index
    %11 = vector.load %arg3[%c0_9, %c0_10, %c0_11] : memref<1x1x8xf32, #tpu.memory_space<vmem>>, vector<1x1x8xf32>
    %12 = vector.shape_cast %11 : vector<1x1x8xf32> to vector<1x8xf32>
    %13 = vector.shape_cast %12 : vector<1x8xf32> to vector<1x8xf32>
    %14 = vector.broadcast %13 : vector<1x8xf32> to vector<8x8xf32>
    %15 = vector.extract_strided_slice %7 {offsets = [0, 0], sizes = [8, 8], strides = [1, 1]} : vector<8x96xf32> to vector<8x8xf32>
    %16 = vector.extract_strided_slice %7 {offsets = [0, 32], sizes = [8, 8], strides = [1, 1]} : vector<8x96xf32> to vector<8x8xf32>
    %17 = vector.extract_strided_slice %7 {offsets = [0, 64], sizes = [8, 8], strides = [1, 1]} : vector<8x96xf32> to vector<8x8xf32>
    %cst_12 = arith.constant dense<0.000000e+00> : vector<8x8xf32>
    %18 = tpu.matmul %15, %16, %cst_12 {dimension_numbers = #tpu.dot_dimension_numbers<[1], [1], [0], [0], [0, 0, 1, 0], [], []>} : vector<8x8xf32>, vector<8x8xf32>, vector<8x8xf32> -> vector<8x8xf32>
    %19 = arith.addf %18, %10 : vector<8x8xf32>
    %cst_13 = arith.constant -1.000000e+01 : f32
    %cst_14 = arith.constant 1.000000e+01 : f32
    %20 = vector.broadcast %cst_13 : f32 to vector<8x8xf32>
    %21 = arith.maximumf %20, %19 : vector<8x8xf32>
    %22 = vector.broadcast %cst_14 : f32 to vector<8x8xf32>
    %23 = arith.minimumf %22, %21 : vector<8x8xf32>
    %24 = arith.addf %23, %14 : vector<8x8xf32>
    %cst_15 = arith.constant dense<0xFF800000> : vector<8xf32>
    %25 = vector.multi_reduction <maximumf>, %24, %cst_15 [1] : vector<8x8xf32> to vector<8xf32>
    %26 = vector.shape_cast %25 : vector<8xf32> to vector<8x1xf32>
    %27 = vector.broadcast %26 : vector<8x1xf32> to vector<8x8xf32>
    %28 = arith.subf %24, %27 : vector<8x8xf32>
    %29 = math.exp %28 : vector<8x8xf32>
    %cst_16 = arith.constant dense<0.000000e+00> : vector<8xf32>
    %30 = vector.multi_reduction <add>, %29, %cst_16 [1] : vector<8x8xf32> to vector<8xf32>
    %31 = vector.shape_cast %30 : vector<8xf32> to vector<8x1xf32>
    %32 = tpu.reciprocal %31 {approx = true} : vector<8x1xf32> -> vector<8x1xf32>
    %33 = vector.broadcast %32 : vector<8x1xf32> to vector<8x8xf32>
    %34 = arith.mulf %29, %33 : vector<8x8xf32>
    %35 = arith.truncf %34 : vector<8x8xf32> to vector<8x8xbf16>
    %36 = arith.truncf %17 : vector<8x8xf32> to vector<8x8xbf16>
    %cst_17 = arith.constant dense<0.000000e+00> : vector<8x8xf32>
    %37 = tpu.matmul %35, %36, %cst_17 {dimension_numbers = #tpu.dot_dimension_numbers<[1], [0], [0], [1], [0, 0, 1, 1], [], []>} : vector<8x8xbf16>, vector<8x8xbf16>, vector<8x8xf32> -> vector<8x8xf32>
    %c0_18 = arith.constant 0 : index
    %c0_19 = arith.constant 0 : index
    %38 = vector.load %arg17[%c0_18, %c0_19] : memref<8x32xf32, #tpu.memory_space<vmem>>, vector<8x8xf32>
    tpu.vector_store %arg17[%c0_18, %c0_19], %37 {strides = array<i32>} : memref<8x32xf32, #tpu.memory_space<vmem>>, vector<8x8xf32>,
    %39 = vector.extract_strided_slice %7 {offsets = [0, 8], sizes = [8, 8], strides = [1, 1]} : vector<8x96xf32> to vector<8x8xf32>
    %40 = vector.extract_strided_slice %7 {offsets = [0, 40], sizes = [8, 8], strides = [1, 1]} : vector<8x96xf32> to vector<8x8xf32>
    %41 = vector.extract_strided_slice %7 {offsets = [0, 72], sizes = [8, 8], strides = [1, 1]} : vector<8x96xf32> to vector<8x8xf32>
    %cst_20 = arith.constant dense<0.000000e+00> : vector<8x8xf32>
    %42 = tpu.matmul %39, %40, %cst_20 {dimension_numbers = #tpu.dot_dimension_numbers<[1], [1], [0], [0], [0, 0, 1, 0], [], []>} : vector<8x8xf32>, vector<8x8xf32>, vector<8x8xf32> -> vector<8x8xf32>
    %43 = arith.addf %42, %10 : vector<8x8xf32>
    %cst_21 = arith.constant -1.000000e+01 : f32
    %cst_22 = arith.constant 1.000000e+01 : f32
    %44 = vector.broadcast %cst_21 : f32 to vector<8x8xf32>
    %45 = arith.maximumf %44, %43 : vector<8x8xf32>
    %46 = vector.broadcast %cst_22 : f32 to vector<8x8xf32>
    %47 = arith.minimumf %46, %45 : vector<8x8xf32>
    %48 = arith.addf %47, %14 : vector<8x8xf32>
    %cst_23 = arith.constant dense<0xFF800000> : vector<8xf32>
    %49 = vector.multi_reduction <maximumf>, %48, %cst_23 [1] : vector<8x8xf32> to vector<8xf32>
    %50 = vector.shape_cast %49 : vector<8xf32> to vector<8x1xf32>
    %51 = vector.broadcast %50 : vector<8x1xf32> to vector<8x8xf32>
    %52 = arith.subf %48, %51 : vector<8x8xf32>
    %53 = math.exp %52 : vector<8x8xf32>
    %cst_24 = arith.constant dense<0.000000e+00> : vector<8xf32>
    %54 = vector.multi_reduction <add>, %53, %cst_24 [1] : vector<8x8xf32> to vector<8xf32>
    %55 = vector.shape_cast %54 : vector<8xf32> to vector<8x1xf32>
    %56 = tpu.reciprocal %55 {approx = true} : vector<8x1xf32> -> vector<8x1xf32>
    %57 = vector.broadcast %56 : vector<8x1xf32> to vector<8x8xf32>
    %58 = arith.mulf %53, %57 : vector<8x8xf32>
    %59 = arith.truncf %58 : vector<8x8xf32> to vector<8x8xbf16>
    %60 = arith.truncf %41 : vector<8x8xf32> to vector<8x8xbf16>
    %cst_25 = arith.constant dense<0.000000e+00> : vector<8x8xf32>
    %61 = tpu.matmul %59, %60, %cst_25 {dimension_numbers = #tpu.dot_dimension_numbers<[1], [0], [0], [1], [0, 0, 1, 1], [], []>} : vector<8x8xbf16>, vector<8x8xbf16>, vector<8x8xf32> -> vector<8x8xf32>
    %c0_26 = arith.constant 0 : index
    %c8 = arith.constant 8 : index
    %62 = vector.load %arg17[%c0_26, %c8] : memref<8x32xf32, #tpu.memory_space<vmem>>, vector<8x8xf32>
    tpu.vector_store %arg17[%c0_26, %c8], %61 {strides = array<i32>} : memref<8x32xf32, #tpu.memory_space<vmem>>, vector<8x8xf32>,
    %63 = vector.extract_strided_slice %7 {offsets = [0, 16], sizes = [8, 8], strides = [1, 1]} : vector<8x96xf32> to vector<8x8xf32>
    %64 = vector.extract_strided_slice %7 {offsets = [0, 48], sizes = [8, 8], strides = [1, 1]} : vector<8x96xf32> to vector<8x8xf32>
    %65 = vector.extract_strided_slice %7 {offsets = [0, 80], sizes = [8, 8], strides = [1, 1]} : vector<8x96xf32> to vector<8x8xf32>
    %cst_27 = arith.constant dense<0.000000e+00> : vector<8x8xf32>
    %66 = tpu.matmul %63, %64, %cst_27 {dimension_numbers = #tpu.dot_dimension_numbers<[1], [1], [0], [0], [0, 0, 1, 0], [], []>} : vector<8x8xf32>, vector<8x8xf32>, vector<8x8xf32> -> vector<8x8xf32>
    %67 = arith.addf %66, %10 : vector<8x8xf32>
    %cst_28 = arith.constant -1.000000e+01 : f32
    %cst_29 = arith.constant 1.000000e+01 : f32
    %68 = vector.broadcast %cst_28 : f32 to vector<8x8xf32>
    %69 = arith.maximumf %68, %67 : vector<8x8xf32>
    %70 = vector.broadcast %cst_29 : f32 to vector<8x8xf32>
    %71 = arith.minimumf %70, %69 : vector<8x8xf32>
    %72 = arith.addf %71, %14 : vector<8x8xf32>
    %cst_30 = arith.constant dense<0xFF800000> : vector<8xf32>
    %73 = vector.multi_reduction <maximumf>, %72, %cst_30 [1] : vector<8x8xf32> to vector<8xf32>
    %74 = vector.shape_cast %73 : vector<8xf32> to vector<8x1xf32>
    %75 = vector.broadcast %74 : vector<8x1xf32> to vector<8x8xf32>
    %76 = arith.subf %72, %75 : vector<8x8xf32>
    %77 = math.exp %76 : vector<8x8xf32>
    %cst_31 = arith.constant dense<0.000000e+00> : vector<8xf32>
    %78 = vector.multi_reduction <add>, %77, %cst_31 [1] : vector<8x8xf32> to vector<8xf32>
    %79 = vector.shape_cast %78 : vector<8xf32> to vector<8x1xf32>
    %80 = tpu.reciprocal %79 {approx = true} : vector<8x1xf32> -> vector<8x1xf32>
    %81 = vector.broadcast %80 : vector<8x1xf32> to vector<8x8xf32>
    %82 = arith.mulf %77, %81 : vector<8x8xf32>
    %83 = arith.truncf %82 : vector<8x8xf32> to vector<8x8xbf16>
    %84 = arith.truncf %65 : vector<8x8xf32> to vector<8x8xbf16>
    %cst_32 = arith.constant dense<0.000000e+00> : vector<8x8xf32>
    %85 = tpu.matmul %83, %84, %cst_32 {dimension_numbers = #tpu.dot_dimension_numbers<[1], [0], [0], [1], [0, 0, 1, 1], [], []>} : vector<8x8xbf16>, vector<8x8xbf16>, vector<8x8xf32> -> vector<8x8xf32>
    %c0_33 = arith.constant 0 : index
    %c16 = arith.constant 16 : index
    %86 = vector.load %arg17[%c0_33, %c16] : memref<8x32xf32, #tpu.memory_space<vmem>>, vector<8x8xf32>
    tpu.vector_store %arg17[%c0_33, %c16], %85 {strides = array<i32>} : memref<8x32xf32, #tpu.memory_space<vmem>>, vector<8x8xf32>,
    %87 = vector.extract_strided_slice %7 {offsets = [0, 24], sizes = [8, 8], strides = [1, 1]} : vector<8x96xf32> to vector<8x8xf32>
    %88 = vector.extract_strided_slice %7 {offsets = [0, 56], sizes = [8, 8], strides = [1, 1]} : vector<8x96xf32> to vector<8x8xf32>
    %89 = vector.extract_strided_slice %7 {offsets = [0, 88], sizes = [8, 8], strides = [1, 1]} : vector<8x96xf32> to vector<8x8xf32>
    %cst_34 = arith.constant dense<0.000000e+00> : vector<8x8xf32>
    %90 = tpu.matmul %87, %88, %cst_34 {dimension_numbers = #tpu.dot_dimension_numbers<[1], [1], [0], [0], [0, 0, 1, 0], [], []>} : vector<8x8xf32>, vector<8x8xf32>, vector<8x8xf32> -> vector<8x8xf32>
    %91 = arith.addf %90, %10 : vector<8x8xf32>
    %cst_35 = arith.constant -1.000000e+01 : f32
    %cst_36 = arith.constant 1.000000e+01 : f32
    %92 = vector.broadcast %cst_35 : f32 to vector<8x8xf32>
    %93 = arith.maximumf %92, %91 : vector<8x8xf32>
    %94 = vector.broadcast %cst_36 : f32 to vector<8x8xf32>
    %95 = arith.minimumf %94, %93 : vector<8x8xf32>
    %96 = arith.addf %95, %14 : vector<8x8xf32>
    %cst_37 = arith.constant dense<0xFF800000> : vector<8xf32>
    %97 = vector.multi_reduction <maximumf>, %96, %cst_37 [1] : vector<8x8xf32> to vector<8xf32>
    %98 = vector.shape_cast %97 : vector<8xf32> to vector<8x1xf32>
    %99 = vector.broadcast %98 : vector<8x1xf32> to vector<8x8xf32>
    %100 = arith.subf %96, %99 : vector<8x8xf32>
    %101 = math.exp %100 : vector<8x8xf32>
    %cst_38 = arith.constant dense<0.000000e+00> : vector<8xf32>
    %102 = vector.multi_reduction <add>, %101, %cst_38 [1] : vector<8x8xf32> to vector<8xf32>
    %103 = vector.shape_cast %102 : vector<8xf32> to vector<8x1xf32>
    %104 = tpu.reciprocal %103 {approx = true} : vector<8x1xf32> -> vector<8x1xf32>
    %105 = vector.broadcast %104 : vector<8x1xf32> to vector<8x8xf32>
    %106 = arith.mulf %101, %105 : vector<8x8xf32>
    %107 = arith.truncf %106 : vector<8x8xf32> to vector<8x8xbf16>
    %108 = arith.truncf %89 : vector<8x8xf32> to vector<8x8xbf16>
    %cst_39 = arith.constant dense<0.000000e+00> : vector<8x8xf32>
    %109 = tpu.matmul %107, %108, %cst_39 {dimension_numbers = #tpu.dot_dimension_numbers<[1], [0], [0], [1], [0, 0, 1, 1], [], []>} : vector<8x8xbf16>, vector<8x8xbf16>, vector<8x8xf32> -> vector<8x8xf32>
    %c0_40 = arith.constant 0 : index
    %c24 = arith.constant 24 : index
    %110 = vector.load %arg17[%c0_40, %c24] : memref<8x32xf32, #tpu.memory_space<vmem>>, vector<8x8xf32>
    tpu.vector_store %arg17[%c0_40, %c24], %109 {strides = array<i32>} : memref<8x32xf32, #tpu.memory_space<vmem>>, vector<8x8xf32>,
    %c0_41 = arith.constant 0 : index
    %c0_42 = arith.constant 0 : index
    %111 = vector.load %arg17[%c0_41, %c0_42] : memref<8x32xf32, #tpu.memory_space<vmem>>, vector<8x32xf32>
    %112 = arith.truncf %111 : vector<8x32xf32> to vector<8x32xbf16>
    %c0_43 = arith.constant 0 : index
    %c0_44 = arith.constant 0 : index
    %113 = vector.load %arg6[%c0_43, %c0_44] : memref<32x32xbf16, #tpu.memory_space<vmem>>, vector<32x32xbf16>
    %cst_45 = arith.constant dense<0.000000e+00> : vector<8x32xf32>
    %114 = tpu.matmul %112, %113, %cst_45 {dimension_numbers = #tpu.dot_dimension_numbers<[1], [0], [0], [1], [0, 0, 1, 1], [], []>} : vector<8x32xbf16>, vector<32x32xbf16>, vector<8x32xf32> -> vector<8x32xf32>
    %c0_46 = arith.constant 0 : index
    %c0_47 = arith.constant 0 : index
    %115 = vector.load %arg7[%c0_46, %c0_47] : memref<1x32xf32, #tpu.memory_space<vmem>>, vector<1x32xf32>
    %116 = vector.broadcast %115 : vector<1x32xf32> to vector<8x32xf32>
    %117 = arith.addf %114, %116 : vector<8x32xf32>
    %118 = arith.addf %1, %117 : vector<8x32xf32>
    %c0_48 = arith.constant 0 : index
    %c0_49 = arith.constant 0 : index
    %119 = vector.load %arg8[%c0_48, %c0_49] : memref<1x32xf32, #tpu.memory_space<vmem>>, vector<1x32xf32>
    %c0_50 = arith.constant 0 : index
    %c0_51 = arith.constant 0 : index
    %120 = vector.load %arg9[%c0_50, %c0_51] : memref<1x32xf32, #tpu.memory_space<vmem>>, vector<1x32xf32>
    %cst_52 = arith.constant dense<0.000000e+00> : vector<8xf32>
    %121 = vector.multi_reduction <add>, %118, %cst_52 [1] : vector<8x32xf32> to vector<8xf32>
    %122 = vector.shape_cast %121 : vector<8xf32> to vector<8x1xf32>
    %cst_53 = arith.constant 3.200000e+01 : f32
    %123 = vector.broadcast %cst_53 : f32 to vector<8x1xf32>
    %124 = arith.divf %122, %123 : vector<8x1xf32>
    %125 = vector.broadcast %124 : vector<8x1xf32> to vector<8x32xf32>
    %126 = arith.subf %118, %125 : vector<8x32xf32>
    %127 = vector.broadcast %124 : vector<8x1xf32> to vector<8x32xf32>
    %128 = arith.subf %118, %127 : vector<8x32xf32>
    %129 = arith.mulf %126, %128 : vector<8x32xf32>
    %cst_54 = arith.constant dense<0.000000e+00> : vector<8xf32>
    %130 = vector.multi_reduction <add>, %129, %cst_54 [1] : vector<8x32xf32> to vector<8xf32>
    %131 = vector.shape_cast %130 : vector<8xf32> to vector<8x1xf32>
    %cst_55 = arith.constant 3.200000e+01 : f32
    %132 = vector.broadcast %cst_55 : f32 to vector<8x1xf32>
    %133 = arith.divf %131, %132 : vector<8x1xf32>
    %134 = vector.broadcast %124 : vector<8x1xf32> to vector<8x32xf32>
    %135 = arith.subf %118, %134 : vector<8x32xf32>
    %cst_56 = arith.constant 9.99999974E-6 : f32
    %136 = vector.broadcast %cst_56 : f32 to vector<8x1xf32>
    %137 = arith.addf %133, %136 : vector<8x1xf32>
    %138 = math.rsqrt %137 : vector<8x1xf32>
    %139 = vector.broadcast %138 : vector<8x1xf32> to vector<8x32xf32>
    %140 = arith.mulf %135, %139 : vector<8x32xf32>
    %141 = vector.broadcast %119 : vector<1x32xf32> to vector<8x32xf32>
    %142 = arith.mulf %140, %141 : vector<8x32xf32>
    %143 = vector.broadcast %120 : vector<1x32xf32> to vector<8x32xf32>
    %144 = arith.addf %142, %143 : vector<8x32xf32>
    %145 = arith.truncf %144 : vector<8x32xf32> to vector<8x32xbf16>
    %c0_57 = arith.constant 0 : index
    %c0_58 = arith.constant 0 : index
    %146 = vector.load %arg10[%c0_57, %c0_58] : memref<32x64xbf16, #tpu.memory_space<vmem>>, vector<32x64xbf16>
    %cst_59 = arith.constant dense<0.000000e+00> : vector<8x64xf32>
    %147 = tpu.matmul %145, %146, %cst_59 {dimension_numbers = #tpu.dot_dimension_numbers<[1], [0], [0], [1], [0, 0, 1, 1], [], []>} : vector<8x32xbf16>, vector<32x64xbf16>, vector<8x64xf32> -> vector<8x64xf32>
    %c0_60 = arith.constant 0 : index
    %c0_61 = arith.constant 0 : index
    %148 = vector.load %arg11[%c0_60, %c0_61] : memref<1x64xf32, #tpu.memory_space<vmem>>, vector<1x64xf32>
    %149 = vector.broadcast %148 : vector<1x64xf32> to vector<8x64xf32>
    %150 = arith.addf %147, %149 : vector<8x64xf32>
    %cst_62 = arith.constant 0.000000e+00 : f32
    %151 = vector.broadcast %cst_62 : f32 to vector<8x64xf32>
    %152 = arith.maximumf %150, %151 : vector<8x64xf32>
    %153 = arith.truncf %152 : vector<8x64xf32> to vector<8x64xbf16>
    %c0_63 = arith.constant 0 : index
    %c0_64 = arith.constant 0 : index
    %154 = vector.load %arg12[%c0_63, %c0_64] : memref<64x32xbf16, #tpu.memory_space<vmem>>, vector<64x32xbf16>
    %cst_65 = arith.constant dense<0.000000e+00> : vector<8x32xf32>
    %155 = tpu.matmul %153, %154, %cst_65 {dimension_numbers = #tpu.dot_dimension_numbers<[1], [0], [0], [1], [0, 0, 1, 1], [], []>} : vector<8x64xbf16>, vector<64x32xbf16>, vector<8x32xf32> -> vector<8x32xf32>
    %c0_66 = arith.constant 0 : index
    %c0_67 = arith.constant 0 : index
    %156 = vector.load %arg13[%c0_66, %c0_67] : memref<1x32xf32, #tpu.memory_space<vmem>>, vector<1x32xf32>
    %157 = vector.broadcast %156 : vector<1x32xf32> to vector<8x32xf32>
    %158 = arith.addf %155, %157 : vector<8x32xf32>
    %159 = arith.addf %144, %158 : vector<8x32xf32>
    %c0_68 = arith.constant 0 : index
    %c0_69 = arith.constant 0 : index
    %160 = vector.load %arg14[%c0_68, %c0_69] : memref<1x32xf32, #tpu.memory_space<vmem>>, vector<1x32xf32>
    %c0_70 = arith.constant 0 : index
    %c0_71 = arith.constant 0 : index
    %161 = vector.load %arg15[%c0_70, %c0_71] : memref<1x32xf32, #tpu.memory_space<vmem>>, vector<1x32xf32>
    %cst_72 = arith.constant dense<0.000000e+00> : vector<8xf32>
    %162 = vector.multi_reduction <add>, %159, %cst_72 [1] : vector<8x32xf32> to vector<8xf32>
    %163 = vector.shape_cast %162 : vector<8xf32> to vector<8x1xf32>
    %cst_73 = arith.constant 3.200000e+01 : f32
    %164 = vector.broadcast %cst_73 : f32 to vector<8x1xf32>
    %165 = arith.divf %163, %164 : vector<8x1xf32>
    %166 = vector.broadcast %165 : vector<8x1xf32> to vector<8x32xf32>
    %167 = arith.subf %159, %166 : vector<8x32xf32>
    %168 = vector.broadcast %165 : vector<8x1xf32> to vector<8x32xf32>
    %169 = arith.subf %159, %168 : vector<8x32xf32>
    %170 = arith.mulf %167, %169 : vector<8x32xf32>
    %cst_74 = arith.constant dense<0.000000e+00> : vector<8xf32>
    %171 = vector.multi_reduction <add>, %170, %cst_74 [1] : vector<8x32xf32> to vector<8xf32>
    %172 = vector.shape_cast %171 : vector<8xf32> to vector<8x1xf32>
    %cst_75 = arith.constant 3.200000e+01 : f32
    %173 = vector.broadcast %cst_75 : f32 to vector<8x1xf32>
    %174 = arith.divf %172, %173 : vector<8x1xf32>
    %175 = vector.broadcast %165 : vector<8x1xf32> to vector<8x32xf32>
    %176 = arith.subf %159, %175 : vector<8x32xf32>
    %cst_76 = arith.constant 9.99999974E-6 : f32
    %177 = vector.broadcast %cst_76 : f32 to vector<8x1xf32>
    %178 = arith.addf %174, %177 : vector<8x1xf32>
    %179 = math.rsqrt %178 : vector<8x1xf32>
    %180 = vector.broadcast %179 : vector<8x1xf32> to vector<8x32xf32>
    %181 = arith.mulf %176, %180 : vector<8x32xf32>
    %182 = vector.broadcast %160 : vector<1x32xf32> to vector<8x32xf32>
    %183 = arith.mulf %181, %182 : vector<8x32xf32>
    %184 = vector.broadcast %161 : vector<1x32xf32> to vector<8x32xf32>
    %185 = arith.addf %183, %184 : vector<8x32xf32>
    %186 = vector.shape_cast %185 : vector<8x32xf32> to vector<1x8x32xf32>
    %c0_77 = arith.constant 0 : index
    %c0_78 = arith.constant 0 : index
    %c0_79 = arith.constant 0 : index
    %187 = vector.load %arg16[%c0_77, %c0_78, %c0_79] : memref<1x8x32xf32, #tpu.memory_space<vmem>>, vector<1x8x32xf32>
    tpu.vector_store %arg16[%c0_77, %c0_78, %c0_79], %186 {strides = array<i32>} : memref<1x8x32xf32, #tpu.memory_space<vmem>>, vector<1x8x32xf32>,
    return
  }
  func.func @transform_0(%arg0: i32) -> (i32, i32, i32) {
    %c0_i32 = arith.constant 0 : i32
    %c0_i32_0 = arith.constant 0 : i32
    %c0_i32_1 = arith.constant 0 : i32
    return %arg0, %c0_i32, %c0_i32_0 : i32, i32, i32
  }
  func.func @transform_1(%arg0: i32) -> (i32, i32, i32) {
    %c0_i32 = arith.constant 0 : i32
    %c0_i32_0 = arith.constant 0 : i32
    %c0_i32_1 = arith.constant 0 : i32
    return %arg0, %c0_i32, %c0_i32_0 : i32, i32, i32
  }
  func.func @transform_2(%arg0: i32) -> (i32, i32, i32) {
    %c0_i32 = arith.constant 0 : i32
    %c0_i32_0 = arith.constant 0 : i32
    %c0_i32_1 = arith.constant 0 : i32
    return %arg0, %c0_i32, %c0_i32_0 : i32, i32, i32
  }
  func.func @transform_3(%arg0: i32) -> (i32, i32) {
    %c0_i32 = arith.constant 0 : i32
    %c0_i32_0 = arith.constant 0 : i32
    %c0_i32_1 = arith.constant 0 : i32
    return %c0_i32, %c0_i32_0 : i32, i32
  }
  func.func @transform_4(%arg0: i32) -> (i32, i32) {
    %c0_i32 = arith.constant 0 : i32
    %c0_i32_0 = arith.constant 0 : i32
    %c0_i32_1 = arith.constant 0 : i32
    return %c0_i32, %c0_i32_0 : i32, i32
  }
  func.func @transform_5(%arg0: i32) -> (i32, i32) {
    %c0_i32 = arith.constant 0 : i32
    %c0_i32_0 = arith.constant 0 : i32
    %c0_i32_1 = arith.constant 0 : i32
    return %c0_i32, %c0_i32_0 : i32, i32
  }
  func.func @transform_6(%arg0: i32) -> (i32, i32) {
    %c0_i32 = arith.constant 0 : i32
    %c0_i32_0 = arith.constant 0 : i32
    %c0_i32_1 = arith.constant 0 : i32
    return %c0_i32, %c0_i32_0 : i32, i32
  }
  func.func @transform_7(%arg0: i32) -> (i32, i32) {
    %c0_i32 = arith.constant 0 : i32
    %c0_i32_0 = arith.constant 0 : i32
    %c0_i32_1 = arith.constant 0 : i32
    return %c0_i32, %c0_i32_0 : i32, i32
  }
  func.func @transform_8(%arg0: i32) -> (i32, i32) {
    %c0_i32 = arith.constant 0 : i32
    %c0_i32_0 = arith.constant 0 : i32
    %c0_i32_1 = arith.constant 0 : i32
    return %c0_i32, %c0_i32_0 : i32, i32
  }
  func.func @transform_9(%arg0: i32) -> (i32, i32) {
    %c0_i32 = arith.constant 0 : i32
    %c0_i32_0 = arith.constant 0 : i32
    %c0_i32_1 = arith.constant 0 : i32
    return %c0_i32, %c0_i32_0 : i32, i32
  }
  func.func @transform_10(%arg0: i32) -> (i32, i32) {
    %c0_i32 = arith.constant 0 : i32
    %c0_i32_0 = arith.constant 0 : i32
    %c0_i32_1 = arith.constant 0 : i32
    return %c0_i32, %c0_i32_0 : i32, i32
  }
  func.func @transform_11(%arg0: i32) -> (i32, i32) {
    %c0_i32 = arith.constant 0 : i32
    %c0_i32_0 = arith.constant 0 : i32
    %c0_i32_1 = arith.constant 0 : i32
    return %c0_i32, %c0_i32_0 : i32, i32
  }
  func.func @transform_12(%arg0: i32) -> (i32, i32) {
    %c0_i32 = arith.constant 0 : i32
    %c0_i32_0 = arith.constant 0 : i32
    %c0_i32_1 = arith.constant 0 : i32
    return %c0_i32, %c0_i32_0 : i32, i32
  }
  func.func @transform_13(%arg0: i32) -> (i32, i32) {
    %c0_i32 = arith.constant 0 : i32
    %c0_i32_0 = arith.constant 0 : i32
    %c0_i32_1 = arith.constant 0 : i32
    return %c0_i32, %c0_i32_0 : i32, i32
  }
  func.func @transform_14(%arg0: i32) -> (i32, i32) {
    %c0_i32 = arith.constant 0 : i32
    %c0_i32_0 = arith.constant 0 : i32
    %c0_i32_1 = arith.constant 0 : i32
    return %c0_i32, %c0_i32_0 : i32, i32
  }
  func.func @transform_15(%arg0: i32) -> (i32, i32, i32) {
    %c0_i32 = arith.constant 0 : i32
    %c0_i32_0 = arith.constant 0 : i32
    %c0_i32_1 = arith.constant 0 : i32
    return %arg0, %c0_i32, %c0_i32_0 : i32, i32, i32
  }
}

</mosaic_0001>

<bundles_post_ra>
// kernel: tpu_custom_call.1
= control target key start
LH: loop header
LB: loop body
LE: loop exit
PB: predicated region body
PF: predicated region fallthrough
CT: control target
= control target key end

     0   :  { %s1962_s0 = inlined_call_operand.vmem [shape: f32[2,8,32], index: 0, kind: input, shape index: {}]   ;;  %s1963_s1 = inlined_call_operand.hbm [shape: bf16[2,8,8], index: 1, kind: input, shape index: {}]   ;;  %s1964_s2 = inlined_call_operand.hbm [shape: f32[2,1,8], index: 2, kind: input, shape index: {}]   ;;  %s1965_s3 = inlined_call_operand.vmem [shape: bf16[32,96], index: 3, kind: input, shape index: {}]   ;;  %s1966_s4 = inlined_call_operand.vmem [shape: f32[1,96], index: 4, kind: input, shape index: {}]   ;;  %s1967_s5 = inlined_call_operand.vmem [shape: bf16[32,32], index: 5, kind: input, shape index: {}]   ;;  %s1968_s6 = inlined_call_operand.vmem [shape: f32[1,32], index: 6, kind: input, shape index: {}]   ;;  %s1969_s7 = inlined_call_operand.vmem [shape: f32[1,32], index: 7, kind: input, shape index: {}]   ;;  %s1970_s8 = inlined_call_operand.vmem [shape: f32[1,32], index: 8, kind: input, shape index: {}]   ;;  %s1971_s9 = inlined_call_operand.hbm [shape: bf16[32,64], index: 9, kind: input, shape index: {}]   ;;  %s1972_s10 = inlined_call_operand.vmem [shape: f32[1,64], index: 10, kind: input, shape index: {}]   ;;  %s1973_s11 = inlined_call_operand.vmem [shape: bf16[64,32], index: 11, kind: input, shape index: {}]   ;;  %s1974_s12 = inlined_call_operand.vmem [shape: f32[1,32], index: 12, kind: input, shape index: {}]   ;;  %s1975_s13 = inlined_call_operand.vmem [shape: f32[1,32], index: 13, kind: input, shape index: {}]   ;;  %s1976_s14 = inlined_call_operand.vmem [shape: f32[1,32], index: 14, kind: input, shape index: {}]   ;;  %s1977_s15 = inlined_call_operand.hbm [shape: f32[2,8,32], index: 15, kind: output, shape index: {}]  }
   0x1   :  { %1987 = sst [smem:[#allocation21_spill]] %s1970_s8 }
   0x2   :  { %1988 = sst [smem:[#allocation22_spill]] %s1971_s9 }
   0x3   :  { %1989 = sst [smem:[#allocation23_spill]] %s1972_s10 }
   0x4   :  { %1990 = sst [smem:[#allocation24_spill]] %s1974_s12 }
   0x5   :  { %1991 = sst [smem:[#allocation25_spill]] %s1975_s13 }
   0x6   :  { %1992 = sst [smem:[#allocation26_spill]] %s1976_s14 }
   0x7   :  { %1993 = sst [smem:[#allocation27_spill]] %s1977_s15 }
   0x8   :  { %20 = vsyncpa [#allocation4], 0 }
   0x9   :  { %22 = vsyncpa [#allocation4 + $0x1], 0 }
   0xa   :  { %23 = vsyncpa [#allocation7], 0 }
   0xb   :  { %25 = vsyncpa [#allocation7 + $0x1], 0 }
   0xc   :  { %26 = vsyncpa [#allocation5], 0 }
   0xd   :  { %28 = vsyncpa [#allocation5 + $0x1], 0  ;;  %s1693_s18 = smov 0   ;;  %s1695_s19 = smov 0  }
   0xe   :  { %s1697_s20 = smov 0   ;;  %s1699_s21 = smov 0  }
   0xf LB: > { %1994 = sst [smem:[#allocation14_spill]] %s1581_s18  ;;  %s1717_s25 = sadd.s32 4294967295, %s1593_s21   ;;  %s1593_s21 = sphi %s1699_s21, %s2019_s21   ;;  %s1589_s20 = sphi %s1697_s20, %s2021_s20   ;;  %s1585_s19 = sphi %s1695_s19, %s2023_s19   ;;  %s1581_s18 = sphi %s1693_s18, %s2022_s18  }
  0x10   : > { %1995 = sst [smem:[#allocation15_spill]] %s1589_s20  ;;  %p1235_p0 = scmp.ge.s32.totalorder %s1593_s21, 1 }
  0x11   : > { %1996 = sst [smem:[#allocation16_spill]] %s1593_s21  ;;  %p81_p1 = scmp.eq.s32.totalorder %s1717_s25, 0 }
  0x12   : > { %s1997_s9 = sld [smem:[#allocation22_spill]]  ;;  %p395_p2 = scmp.lt.s32.totalorder %s1593_s21, 3 }
  0x13   : > { %s1595_s27 = smov [#allocation8]   ;;  %s1596_s29 = smov 64  }
  0x14   : > { %p1722_p3 = pnand %p1235_p0, %p395_p2  ;;  %s426_s28 = sshll.u32 %s1595_s27, 4  ;;  %s427_s28 = int_to_ptr.vmem [resolvable:$true] %s426_s28 }
  0x15   : > { %s1597_s30 = smov 4   ;;  %s1234_s16 = sadd.s32 4294967294, %s1593_s21  }
  0x16   : > { %p1329_p4 = pneg %p1722_p3  ;;  %s1733_s17 = sadd.s32 1, %s1593_s21  }
  0x17   : > { %1999 = sst [smem:[#allocation17_spill]] %s1733_s17  ;;  %s67_s22 = sadd.s32 1, %s1589_s20 }
  0x18   : > { %s424_s24 = sshll.u32 %s1997_s9, 4  ;;  %p1330_p6 = pnand %p1329_p4, %p81_p1  ;;  %s425_s24 = int_to_ptr.hbm [resolvable:$true] %s424_s24 }
  0x19   : > { %s64_s23 = ssub.s32 %s1593_s21, %s1733_s17  ;;  %p74_p7 = scmp.ne.s32.totalorder %s1589_s20, %s1585_s19 }
  0x1a   : > { %1332 = dma.hbm_to_vmem [thread:$0]  (!%p1330_p6), %s425_s24, 256, %s427_s28, [#allocation7], %s1596_s29, %s1596_s29, %s1597_s30  }
  0x1b   : > { %p65_p8 = scmp.eq.s32.totalorder %s64_s23, 0  ;;  %p75_p9 = scmp.eq.s32.totalorder %s1593_s21, 0 }
  0x1c   : > { %p80_p10 = scmp.ne.s32.totalorder %s1585_s19, %s1581_s18  ;;  %p382_p11 = scmp.eq.s32.totalorder %s1717_s25, 1 }
  0x1d   : > { %s1745_s27 = scalar_select %p65_p8, %s1589_s20, %s67_s22  }
  0x1e   : > { %p1747_p12 = por %p75_p9, %p74_p7  ;;  %p1753_p13 = por %p81_p1, %p80_p10 }
  0x1f   : > { %2000 = sst [smem:[#allocation18_spill]] %s1745_s27  ;;  %p1757_p0 = por %p382_p11, %p74_p7 }
  0x20   : > { %p388_p2 = scmp.eq.s32.totalorder %s1234_s16, 1  ;;  %p1345_p4 = scmp.lt.s32.totalorder %s1593_s21, 2 }
  0x21   : > { %s2003_s28 = scalar_select %p1757_p0, 1, 0 }
  0x22   : > { %s1763_s29 = sand.u32 1, %s1589_s20   ;;  %p1765_p6 = por %p388_p2, %p80_p10 }
  0x23   : > { %2004 = sst [smem:[#allocation19_spill]] %s2003_s28  ;;  %s1238_s22 = sshll.u32 %s1763_s29, 2 }
  0x24   : > { %s2005_s30 = scalar_select %p1765_p6, 1, 0 }
  0x25   : > { %s1239_s23 = sshll.u32 %s1593_s21, 2  ;;  %s466_s15 = scalar_lea.vmem [#allocation3], %s1238_s22 }
  0x26   : > { %2006 = sst [smem:[#allocation20_spill]] %s2005_s30  ;;  %s470_s18 = scalar_lea.hbm %s1963_s1, %s1239_s23 }
  0x27   : > { %s472_s14 = sshll.u32 %s470_s18, 4  ;;  %s474_s13 = sshll.u32 %s466_s15, 4  ;;  %s473_s14 = int_to_ptr.hbm [resolvable:$true] %s472_s14  ;;  %s475_s13 = int_to_ptr.vmem [resolvable:$true] %s474_s13 }
  0x28   : > { %p1776_p7 = pnand %p1345_p4, %p1747_p12  ;;  %s481_s20 = sand.u32 1, %s1593_s21  }
  0x29   : > { %s487_s12 = scalar_lea.hbm %s1964_s2, %s1593_s21  ;;  %s463_s10 = scalar_lea.sflag [#allocation4], %s1763_s29 }
  0x2a   : > { %s1459_s17 = sshra.s32 %s473_s14, 4  ;;  %p1463_p9 = pneg %p1776_p7  ;;  %s1460_s17 = int_to_ptr.hbm [resolvable:$true] %s1459_s17 }
  0x2b   : > { %s1461_s18 = scalar_lea.hbm %s1460_s17, 4  ;;  %s1466_s27 = scalar_lea.hbm %s1963_s1, 8 }
  0x2c   : > { %p1462_p8 = scmp.ne.s32.totalorder %s1460_s17, %s1461_s18  ;;  %p1467_p12 = scmp.lt.s32.totalorder %s1460_s17, %s1963_s1 }
  0x2d   : > { %p1468_p2 = scmp.lt.s32.totalorder %s1466_s27, %s1461_s18 }
  0x2e   : > { %p1464_p10 = pnand %p1463_p9, %p1462_p8 }
  0x2f   : > { %p1469_p4 = por %p1468_p2, %p1467_p12 }
  0x30   : > { %p1465_p11 = pneg %p1464_p10 }
  0x32   : > { %p1470_p5 = pnand %p1469_p4, %p1465_p11 }
  0x34   : > { %1473 = shalt.err (!%p1470_p5)
}
  0x35   : > { %1336 = dma.hbm_to_vmem [thread:$0]  (!%p1776_p7), %s473_s14, 64, %s475_s13, %s463_s10  }
  0x36   : > { %s489_s28 = sshll.u32 %s487_s12, 4  ;;  %s484_s30 = scalar_lea.vmem [#allocation6], %s1763_s29  ;;  %s490_s28 = int_to_ptr.hbm [resolvable:$true] %s489_s28 }
  0x37   : > { %s491_s21 = sshll.u32 %s484_s30, 4  ;;  %s482_s9 = scalar_lea.sflag [#allocation7], %s481_s20  ;;  %s492_s21 = int_to_ptr.vmem [resolvable:$true] %s491_s21 }
  0x38   : > { %s1489_s15 = sshra.s32 %s490_s28, 4  ;;  %s1496_s27 = scalar_lea.hbm %s1964_s2, 2  ;;  %s1490_s15 = int_to_ptr.hbm [resolvable:$true] %s1489_s15 }
  0x39   : > { %s1491_s8 = scalar_lea.hbm %s1490_s15, 1  ;;  %p1497_p5 = scmp.lt.s32.totalorder %s1490_s15, %s1964_s2 }
  0x3a   : > { %p1492_p8 = scmp.ne.s32.totalorder %s1490_s15, %s1491_s8  ;;  %p1498_p12 = scmp.lt.s32.totalorder %s1496_s27, %s1491_s8 }
  0x3c   : > { %p1494_p10 = pnand %p1492_p8, %p1463_p9  ;;  %p1499_p2 = por %p1498_p12, %p1497_p5 }
  0x3e   : > { %p1495_p11 = pneg %p1494_p10 }
  0x40   : > { %p1500_p4 = pnand %p1499_p2, %p1495_p11 }
  0x42   : > { %1503 = shalt.err (!%p1500_p4)
}
  0x43   : > { %1339 = dma.hbm_to_vmem [thread:$0]  (!%p1776_p7), %s490_s28, 16, %s492_s21, %s482_s9  }
  0x44   : > { %500 = sbr.rel (%p1722_p3) target bundleno = 1957 (0x7a5), region = 80  ;;  %s1814_s12 = sand.u32 (!%p1722_p3), 1, %s1585_s19  }
  0x45   : > { %s1241_s13 = sshll.u32 (!%p1722_p3), %s1814_s12, 2  ;;  %s503_s14 = scalar_lea.sflag (!%p1722_p3), [#allocation4], %s1814_s12 }
  0x46   : > { %s1818_s20 = scalar_lea.vmem (!%p1722_p3), [#allocation3], %s1241_s13 }
  0x49   : > { %1564 = dma.done.wait (%p1753_p13), %s503_s14, 64  }
  0x4a   : > { %1566 = vsyncadd (%p1753_p13), %s503_s14, 4294967232  ;;  %s512_s8 = sand.u32 1, %s1717_s25   ;;  %s515_s26 = scalar_lea.vmem [#allocation6], %s1814_s12 }
  0x4b   : > { %s513_s21 = scalar_lea.sflag [#allocation7], %s512_s8 }
  0x4c   : > { %1568 = dma.done.wait (%p1753_p13), %s513_s21, 16  }
  0x4d   : > { %1570 = vsyncadd (%p1753_p13), %s513_s21, 4294967280 }
  0x4e   : > { %1572 = dma.done.wait (%p81_p1), [#allocation7], 256  }
  0x4f   : > { %1574 = vsyncadd (%p81_p1), [#allocation7], 4294967040  ;;  %p576_p3 = scmp.lt.s32.totalorder %s1717_s25, 1  ;;  %v1310_v0 = vld [vmem:[%s1965_s3 + $0x8] sm:$0xff]  ;;  %v1309_v1 = vld [vmem:[%s1965_s3] sm:$0xff]  ;;  %vm603_vm0 = vcmask 261120  }
  0x50   : > { %613 = vmatpush.bf16.msra.mxu0 %v1310_v0  ;;  %v1398_v4 = vld [vmem:[%s1966_s4] ss:$0 sm:$0xff]  ;;  %s1598_s22 = smov 112   ;;  %s1599_s10 = smov 120   ;;  %vm629_vm1 = vcmask 64512   ;;  %vm676_vm2 = vcmask 1043456  }
  0x51   : > { %s577_s29 = scalar_select %p576_p3, %s1717_s25, 1  ;;  %v620_v15 = vld [vmem:[%s1818_s20] sm:$0xf]  ;;  %v1399_v19 = vld [vmem:[%s515_s26] ss:$0 sm:$0xff]  ;;  %vm762_vm3 = vcmask 130112  }
  0x52   : > { %s1600_s13 = smov 96   ;;  %s1601_s14 = smov 72   ;;  %v621_v16 = vunpack.c.l.bf16 %v620_v15  ;;  %vm832_vm4 = vcmask 195712   ;;  %vm902_vm5 = vcmask 261312   ;;  %vm1057_vm10 = vcmask 523264  }
  0x53   : > { %s1244_s16 = sshll.u32 %s577_s29, 3  ;;  %s1602_s8 = smov 80  }
  0x54   : > { %s579_s30 = scalar_lea.vmem %s1962_s0, %s1244_s16  ;;  %614 = vmatpush.bf16.msra.mxu0 %v1309_v1  ;;  %s1603_s21 = smov 88  }
  0x55   : > { %v1845_v2 = vld [vmem:[%s579_s30] sm:$0xff]  ;;  %s1604_s29 = smov 104   ;;  %s1605_s20 = smov 64  }
  0x56   : > { %v582_v3 = vpack.c.bf16 %v1845_v2, %v1845_v2  ;;  %s1606_s26 = smov 40   ;;  %s1607_s16 = smov 48  }
  0x57   : > { %s1608_s23 = smov 56   ;;  %s1609_s28 = smov 24  }
  0x58   : > { %1253 = vmatmul.msk.bf16.vlgmr.msra.gmra.mxu0 %vm603_vm0, %v582_v3  ;;  %s1610_s30 = smov 16   ;;  %s1611_s9 = smov 8  }
  0x59   : > { %s2009_s17 = sld [smem:[#allocation23_spill]] }
  0xd5   : > { %v616_v5 = vpop.f32.mrf.mxu0 }
  0xd6   : > { %v617_v6 = vadd.f32 %v1398_v4, %v616_v5 }
  0xd8   : > { %764 = vrot.lane.b32.xlu2 %v617_v6, %s1598_s22  ;;  %694 = vrot.lane.b32.xlu1 %v617_v6, %s1599_s10  ;;  %v669_v38 = vpack.c.bf16 %v617_v6, %v617_v6  ;;  %s2010_s22 = sld [smem:[#allocation24_spill]]  ;;  %s1243_s10 = sshll.u32 %s1814_s12, 3 }
  0xd9   : > { %627 = vrot.lane.b32.xlu0 %v617_v6, %s1600_s13  ;;  %s1306_s13 = sshll.u32 %s1717_s25, 3  ;;  %s575_s25 = scalar_lea.vmem [#allocation9], %s1243_s10 }
  0xda   : > { %s1121_s15 = sshll.u32 %s575_s25, 4  ;;  %s1122_s15 = int_to_ptr.vmem [resolvable:$true] %s1121_s15 }
  0xdd   : > { %v618_v7 = vpop.f32.mrf.mxu0 }
  0xe0   : > { %836 = vrot.lane.b32.xlu2 %v617_v6, %s1601_s14  ;;  %766 = vrot.lane.b32.xlu1 %v617_v6, %s1602_s8 }
  0xe1   : > { %696 = vrot.lane.b32.xlu0 %v617_v6, %s1603_s21  ;;  %s2011_s21 = sld [smem:[#allocation25_spill]] }
  0xe9   : > { %834 = vrot.lane.b32.xlu0 %v617_v6, %s1604_s29 }
 0x132   : > { %v765_v10 = vpop.permute.xlu2 %764 }
 0x13a   : > { %v837_v13 = vpop.permute.xlu2 %836 }
 0x14a   : > { %v695_v8 = vpop.permute.xlu1 %694 }
 0x14b   : > { %v628_v9 = vpop.permute.xlu0 %627 }
 0x14c   : > { %1254 = vmatpush.xpose.msk.msra.mxu1 %vm629_vm1, %v628_v9 }
 0x14f   : > { %1255 = vmatmul.msk.f32.vlgmr.msra.gmra.mxu1 %vm629_vm1, %v617_v6 }
 0x152   : > { %v767_v11 = vpop.permute.xlu1 %766 }
 0x153   : > { %v697_v12 = vpop.permute.xlu0 %696 }
 0x154   : > { %1258 = vmatpush.xpose.msk.msra.mxu3 %vm629_vm1, %v697_v12 }
 0x157   : > { %1259 = vmatmul.msk.f32.vlgmr.msra.gmra.mxu3 %vm629_vm1, %v695_v8 }
 0x158   : > { %1262 = vmatpush.xpose.msk.msrb.mxu3 %vm629_vm1, %v767_v11 }
 0x15b   : > { %v835_v14 = vpop.permute.xlu0 %834 }
 0x15c   : > { %1266 = vmatpush.xpose.msk.msra.mxu3 %vm629_vm1, %v837_v13 }
 0x15f   : > { %1263 = vmatmul.msk.f32.vlgmr.msrb.gmra.mxu3 %vm629_vm1, %v765_v10 }
 0x167   : > { %1267 = vmatmul.msk.f32.vlgmr.msra.gmra.mxu3 %vm629_vm1, %v835_v14 }
 0x1cc   : > { %v651_v17 = vpop.f32.mrf.mxu1 }
 0x1cd   : > { %v652_v18 = vadd.f32 %v651_v17, %v621_v16 }
 0x1cf   : > { %v1256_v20 = vclamps-f32 %v652_v18, 10.0 }
 0x1d1   : > { %v656_v21 = vadd.f32 %v1399_v19, %v1256_v20 }
 0x1d3   : > { %v657_v22 = vsel %vm629_vm1, %v656_v21, -inf }
 0x1d4   : > { %658 = vmax.xlane.f32.xlu1 %v657_v22 }
 0x1da   : > { %v719_v23 = vpop.f32.mrf.mxu3 }
 0x1db   : > { %v720_v24 = vadd.f32 %v719_v23, %v621_v16 }
 0x1dd   : > { %v1260_v25 = vclamps-f32 %v720_v24, 10.0 }
 0x1df   : > { %v724_v26 = vadd.f32 %v1399_v19, %v1260_v25 }
 0x1e1   : > { %v725_v27 = vsel %vm629_vm1, %v724_v26, -inf }
 0x1e2   : > { %v789_v28 = vpop.f32.mrf.mxu3  ;;  %726 = vmax.xlane.f32.xlu0 %v725_v27 }
 0x1e3   : > { %v790_v29 = vadd.f32 %v789_v28, %v621_v16  ;;  %v1312_v28 = vld [vmem:[%s1967_s5 + $0x8] sm:$0xff] }
 0x1e5   : > { %v1264_v30 = vclamps-f32 %v790_v29, 10.0  ;;  %v1311_v29 = vld [vmem:[%s1967_s5] sm:$0xff] }
 0x1e7   : > { %v794_v31 = vadd.f32 %v1399_v19, %v1264_v30 }
 0x1e9   : > { %v795_v32 = vsel %vm629_vm1, %v794_v31, -inf }
 0x1ea   : > { %796 = vmax.xlane.f32.xlu2 %v795_v32  ;;  %v859_v33 = vpop.f32.mrf.mxu3 }
 0x1eb   : > { %v860_v34 = vadd.f32 %v859_v33, %v621_v16 }
 0x1ed   : > { %v1268_v35 = vclamps-f32 %v860_v34, 10.0 }
 0x1ef   : > { %v864_v36 = vadd.f32 %v1399_v19, %v1268_v35  ;;  %v1400_v35 = vld [vmem:[%s1968_s6] ss:$0 sm:$0xff] }
 0x1f1   : > { %v865_v37 = vsel %vm629_vm1, %v864_v36, -inf }
 0x1f2   : > { %866 = vmax.xlane.f32.xlu2 %v865_v37 }
 0x20a   : > { %671 = vrot.lane.b32.xlu2 %v669_v38, %s1605_s20 }
 0x212   : > { %877 = vrot.lane.b32.xlu2 %v669_v38, %s1606_s26  ;;  %s2012_s26 = sld [smem:[#allocation27_spill]] }
 0x218   : > { %s1539_s10 = scalar_lea.hbm %s2012_s26, 16 }
 0x247   : > { %v659_v39 = vpop.xlane.xlu1 %658 }
 0x248   : > { %v660_v40 = vsub.f32 %v656_v21, %v659_v39 }
 0x24a   : > { %v661_v41 = vmul.f32 1.442695, %v660_v40 }
 0x24c   : > { %1407 = vpow2.f32 %v661_v41  ;;  %v1612_v41 = vmov 32.0  }
 0x252   : > { %v1408_v42 = vpop.eup %1407 }
 0x253   : > { %v663_v43 = vsel %vm629_vm1, %v1408_v42, 0.0 }
 0x254   : > { %664 = vadd.xlane.f32.xlu1 %v663_v43 }
 0x255   : > { %v727_v44 = vpop.xlane.xlu0 %726 }
 0x256   : > { %v728_v45 = vsub.f32 %v724_v26, %v727_v44 }
 0x258   : > { %v729_v46 = vmul.f32 1.442695, %v728_v45 }
 0x25a   : > { %1409 = vpow2.f32 %v729_v46 }
 0x25d   : > { %v797_v47 = vpop.xlane.xlu2 %796 }
 0x25e   : > { %v798_v48 = vsub.f32 %v794_v31, %v797_v47 }
 0x260   : > { %v1410_v49 = vpop.eup %1409  ;;  %v799_v50 = vmul.f32 1.442695, %v798_v48 }
 0x261   : > { %v731_v51 = vsel %vm629_vm1, %v1410_v49, 0.0 }
 0x262   : > { %1411 = vpow2.f32 %v799_v50  ;;  %732 = vadd.xlane.f32.xlu1 %v731_v51 }
 0x265   : > { %v867_v52 = vpop.xlane.xlu2 %866 }
 0x266   : > { %v868_v53 = vsub.f32 %v864_v36, %v867_v52 }
 0x268   : > { %v1412_v54 = vpop.eup %1411  ;;  %v869_v55 = vmul.f32 1.442695, %v868_v53  ;;  %v1313_v53 = vld [vmem:[#allocation8] sm:$0xff] }
 0x269   : > { %v801_v56 = vsel %vm629_vm1, %v1412_v54, 0.0 }
 0x26a   : > { %1413 = vpow2.f32 %v869_v55  ;;  %802 = vadd.xlane.f32.xlu0 %v801_v56 }
 0x26d   : > { %v672_v57 = vpop.permute.xlu2 %671 }
 0x26e   : > { %v678_v58 = vsel %vm676_vm2, %v672_v57, 0  ;;  %v1317_v57 = vld [vmem:[%s1973_s11 + $0x10] sm:$0xff] }
 0x26f   : > { %687 = vmatpush.bf16.msra.mxu2 %v678_v58 }
 0x270   : > { %v1414_v59 = vpop.eup %1413 }
 0x271   : > { %v871_v60 = vsel %vm629_vm1, %v1414_v59, 0.0 }
 0x272   : > { %872 = vadd.xlane.f32.xlu0 %v871_v60 }
 0x275   : > { %v878_v61 = vpop.permute.xlu2 %877 }
 0x276   : > { %v883_v62 = vsel %vm676_vm2, %v878_v61, 0 }
 0x277   : > { %892 = vmatpush.bf16.msrb.mxu0 %v883_v62 }
 0x27b   : > { %807 = vrot.lane.b32.xlu1 %v669_v38, %s1607_s16  ;;  %s2008_s16 = sld [smem:[#allocation21_spill]] }
 0x286   : > { %737 = vrot.lane.b32.xlu0 %v669_v38, %s1608_s23 }
 0x2c7   : > { %v665_v63 = vpop.xlane.xlu1 %664 }
 0x2c8   : > { %1415 = vrcp.f32 %v665_v63 }
 0x2ce   : > { %v1416_v0 = vpop.eup %1415 }
 0x2cf   : > { %v667_v1 = vmul.f32 %v1416_v0, %v1408_v42 }
 0x2d1   : > { %v668_v3 = vpack.c.bf16 %v667_v1, %v667_v1  ;;  %v1401_v1 = vld [vmem:[%s1969_s7] ss:$0 sm:$0xff] }
 0x2d3   : > { %1257 = vmatmul.msk.bf16.vlgmr.msra.gmra.mxu2 %vm629_vm1, %v668_v3 }
 0x2d5   : > { %v733_v5 = vpop.xlane.xlu1 %732 }
 0x2dd   : > { %v803_v4 = vpop.xlane.xlu0 %802 }
 0x2de   : > { %1417 = vrcp.f32 %v803_v4  ;;  %v1402_v4 = vld [vmem:[%s2008_s16] ss:$0 sm:$0xff]  ;;  %s1119_s16 = scalar_lea.hbm %s2012_s26, %s1306_s13 }
 0x2df   : > { %s1123_s24 = sshll.u32 %s1119_s16, 4  ;;  %s1124_s24 = int_to_ptr.hbm [resolvable:$true] %s1123_s24 }
 0x2e0   : > { %s1533_s18 = sshra.s32 %s1124_s24, 4  ;;  %s1534_s18 = int_to_ptr.hbm [resolvable:$true] %s1533_s18 }
 0x2e1   : > { %s1535_s27 = scalar_lea.hbm %s1534_s18, 8  ;;  %p1540_p9 = scmp.lt.s32.totalorder %s1534_s18, %s2012_s26 }
 0x2e2   : > { %p1536_p1 = scmp.ne.s32.totalorder %s1534_s18, %s1535_s27  ;;  %p1541_p8 = scmp.lt.s32.totalorder %s1539_s10, %s1535_s27 }
 0x2e4   : > { %v1418_v7 = vpop.eup %1417  ;;  %p1537_p13 = pnand %p1536_p1, %p1757_p0  ;;  %p1542_p10 = por %p1541_p8, %p1540_p9 }
 0x2e5   : > { %v873_v6 = vpop.xlane.xlu0 %872  ;;  %v805_v9 = vmul.f32 %v1418_v7, %v1412_v54  ;;  %v1318_v54 = vld [vmem:[%s1973_s11 + $0x18] sm:$0xff] }
 0x2e6   : > { %1419 = vrcp.f32 %v873_v6  ;;  %p1538_p7 = pneg %p1537_p13 }
 0x2e7   : > { %1421 = vrcp.f32 %v733_v5  ;;  %v806_v14 = vpack.c.bf16 %v805_v9, %v805_v9  ;;  %v1316_v9 = vld [vmem:[%s1973_s11 + $0x8] sm:$0xff] }
 0x2e8   : > { %1423 = vrcp.f32 %v1612_v41  ;;  %p1543_p11 = pnand %p1542_p10, %p1538_p7 }
 0x2ec   : > { %v1420_v8 = vpop.eup %1419 }
 0x2ed   : > { %v875_v10 = vmul.f32 %v1420_v8, %v1414_v59  ;;  %v808_v11 = vpop.permute.xlu1 %807  ;;  %v1422_v15 = vpop.eup %1421 }
 0x2ee   : > { %v813_v12 = vsel %vm676_vm2, %v808_v11, 0  ;;  %v735_v16 = vmul.f32 %v1422_v15, %v1410_v49  ;;  %v1424_v42 = vpop.eup %1423  ;;  %v1403_v11 = vld [vmem:[%s2009_s17] ss:$0 sm:$0xff]  ;;  %s1109_s17 = scalar_lea.sflag [#allocation5], %s1814_s12 }
 0x2ef   : > { %822 = vmatpush.bf16.msrb.mxu2 %v813_v12  ;;  %v876_v13 = vpack.c.bf16 %v875_v10, %v875_v10  ;;  %v949_v43 = vmul.f32 32.0, %v1424_v42  ;;  %vm953_vm6 = vweird.f32 %v1424_v42  ;;  %v1315_v10 = vld [vmem:[%s1973_s11] sm:$0xff] }
 0x2f0   : > { %v736_v19 = vpack.c.bf16 %v735_v16, %v735_v16 }
 0x2f1   : > { %1269 = vmatmul.msk.bf16.vlgmr.msrb.gmra.mxu0 %vm629_vm1, %v876_v13  ;;  %v950_v44 = vsub.f32 1.0, %v949_v43 }
 0x2f2   : > { %1265 = vmatmul.msk.bf16.vlgmr.msrb.gmra.mxu2 %vm629_vm1, %v806_v14 }
 0x2f3   : > { %v951_v45 = vmul.f32 %v1424_v42, %v950_v44  ;;  %1065 = vmatpush.bf16.msra.mxu2 %v1318_v54 }
 0x2f5   : > { %v952_v46 = vadd.f32 %v1424_v42, %v951_v45 }
 0x2f7   : > { %v954_v47 = vsel %vm953_vm6, %v1424_v42, %v952_v46  ;;  %1066 = vmatpush.bf16.msra.mxu2 %v1317_v57 }
 0x2f8   : > { %v738_v17 = vpop.permute.xlu0 %737 }
 0x2f9   : > { %v743_v18 = vsel %vm676_vm2, %v738_v17, 0  ;;  %v1404_v17 = vld [vmem:[%s2010_s22] ss:$0 sm:$0xff] }
 0x2fa   : > { %752 = vmatpush.bf16.msrb.mxu1 %v743_v18 }
 0x2fb   : > { %1067 = vmatpush.bf16.msra.mxu2 %v1316_v9 }
 0x2fd   : > { %1261 = vmatmul.msk.bf16.vlgmr.msrb.gmra.mxu1 %vm629_vm1, %v736_v19 }
 0x2fe   : > { %935 = vmatpush.bf16.msra.mxu1 %v1312_v28 }
 0x2ff   : > { %1068 = vmatpush.bf16.msra.mxu2 %v1315_v10 }
 0x302   : > { %936 = vmatpush.bf16.msra.mxu1 %v1311_v29 }
 0x356   : > { %v689_v20 = vpop.f32.mrf.mxu2 }
 0x357   : > { %693 = vst.msk [vmem:[#allocation2] sm:$0xff] %vm629_vm1, %v689_v20 }
 0x35e   : > { %v691_v21 = vpop.f32.mrf.mxu2 }
 0x36e   : > { %v894_v22 = vpop.f32.mrf.mxu0 }
 0x36f   : > { %899 = vrot.lane.b32.xlu0 %v894_v22, %s1609_s28 }
 0x375   : > { %v824_v23 = vpop.f32.mrf.mxu2 }
 0x376   : > { %829 = vrot.lane.b32.xlu1 %v824_v23, %s1610_s30  ;;  %v896_v24 = vpop.f32.mrf.mxu0 }
 0x37a   : > { %v754_v25 = vpop.f32.mrf.mxu1 }
 0x37b   : > { %759 = vrot.lane.b32.xlu2 %v754_v25, %s1611_s9  ;;  %s2014_s9 = sld [smem:[#allocation26_spill]] }
 0x37d   : > { %v826_v26 = vpop.f32.mrf.mxu2 }
 0x382   : > { %v756_v27 = vpop.f32.mrf.mxu1 }
 0x3d5   : > { %v760_v30 = vpop.permute.xlu2 %759 }
 0x3d6   : > { %763 = vst.msk [vmem:[#allocation2] sm:$0xff] %vm762_vm3, %v760_v30 }
 0x3e1   : > { %v900_v32 = vpop.permute.xlu0 %899 }
 0x3e8   : > { %v830_v31 = vpop.permute.xlu1 %829 }
 0x3e9   : > { %833 = vst.msk [vmem:[#allocation2] sm:$0xff] %vm832_vm4, %v830_v31 }
 0x3ea   : > { %903 = vst.msk [vmem:[#allocation2] sm:$0xff] %vm902_vm5, %v900_v32 }
 0x3f1   : > { %v904_v33 = vld [vmem:[#allocation2] sm:$0xff] }
 0x3f2   : > { %v905_v34 = vpack.c.bf16 %v904_v33, %v904_v33 }
 0x3f4   : > { %1278 = vmatmul.msk.bf16.vlgmr.msra.gmra.mxu1 %vm603_vm0, %v905_v34 }
 0x471   : > { %v938_v36 = vpop.f32.mrf.mxu1 }
 0x472   : > { %v939_v37 = vadd.f32 %v1400_v35, %v938_v36 }
 0x474   : > { %v942_v38 = vadd.f32 %v939_v37, %v1845_v2  ;;  %v1314_v2 = vld [vmem:[#allocation8 + $0x8] sm:$0xff] }
 0x475   : > { %1012 = vmatpush.bf16.msrb.mxu3 %v1314_v2  ;;  %v1405_v37 = vld [vmem:[%s2011_s21] ss:$0 sm:$0xff] }
 0x476   : > { %v945_v39 = vsel %vm603_vm0, %v942_v38, 0.0 }
 0x477   : > { %946 = vadd.xlane.f32.xlu2 %v945_v39 }
 0x479   : > { %v940_v40 = vpop.f32.mrf.mxu1  ;;  %1013 = vmatpush.bf16.msrb.mxu3 %v1313_v53 }
 0x47a   : > { %v1406_v40 = vld [vmem:[%s2014_s9] ss:$0 sm:$0xff] }
 0x4ea   : > { %v947_v48 = vpop.xlane.xlu2 %946 }
 0x4eb   : > { %v955_v49 = vmul.f32 %v954_v47, %v947_v48 }
 0x4ed   : > { %v956_v50 = vsub.f32 %v942_v38, %v955_v49 }
 0x4ef   : > { %v957_v51 = vmul.f32 %v956_v50, %v956_v50 }
 0x4f1   : > { %v958_v52 = vsel %vm603_vm0, %v957_v51, 0.0 }
 0x4f2   : > { %959 = vadd.xlane.f32.xlu1 %v958_v52 }
 0x565   : > { %v960_v55 = vpop.xlane.xlu1 %959 }
 0x566   : > { %v961_v56 = vmul.f32 %v960_v55, %v954_v47 }
 0x568   : > { %v962_v58 = vadd.f32 1e-05, %v961_v56 }
 0x56a   : > { %1425 = vrsqrt.f32 %v962_v58  ;;  %vm969_vm8 = vweird.f32 %v962_v58 }
 0x570   : > { %v1426_v59 = vpop.eup %1425 }
 0x571   : > { %v964_v60 = vmul.f32 %v1426_v59, %v962_v58  ;;  %vm970_vm7 = vweird.f32 %v1426_v59 }
 0x572   : > { %vm971_vm9 = vmor %vm969_vm8, %vm970_vm7 }
 0x573   : > { %v965_v61 = vmul.f32 %v1426_v59, %v964_v60 }
 0x575   : > { %v966_v62 = vmul.f32 0.5, %v965_v61 }
 0x577   : > { %v967_v63 = vsub.f32 1.5, %v966_v62 }
 0x579   : > { %v968_v0 = vmul.f32 %v1426_v59, %v967_v63 }
 0x57b   : > { %v972_v3 = vsel %vm971_vm9, %v1426_v59, %v968_v0 }
 0x57c   : > { %v973_v5 = vmul.f32 %v972_v3, %v956_v50 }
 0x57e   : > { %v977_v6 = vmul.f32 %v1401_v1, %v973_v5 }
 0x580   : > { %v981_v7 = vadd.f32 %v1402_v4, %v977_v6 }
 0x582   : > { %v982_v8 = vpack.c.bf16 %v981_v7, %v981_v7 }
 0x584   : > { %1287 = vmatmul.msk.bf16.vlgmr.msrb.gmra.mxu3 %vm603_vm0, %v982_v8 }
 0x607   : > { %v1015_v12 = vpop.f32.mrf.mxu3 }
 0x608   : > { %v1016_v13 = vadd.f32 %v1403_v11, %v1015_v12 }
 0x60a   : > { %v1019_v14 = vmax.f32 %v1016_v13, 0.0 }
 0x60c   : > { %v1020_v15 = vpack.c.bf16 %v1019_v14, %v1019_v14 }
 0x60e   : > { %1304 = vmatmul.msk.bf16.vlgmr.msra.gmra.mxu2 %vm1057_vm10, %v1020_v15 }
 0x60f   : > { %v1017_v16 = vpop.f32.mrf.mxu3 }
 0x691   : > { %v1070_v18 = vpop.f32.mrf.mxu2 }
 0x692   : > { %v1071_v19 = vadd.f32 %v1404_v17, %v1070_v18 }
 0x694   : > { %v1074_v20 = vadd.f32 %v1071_v19, %v981_v7 }
 0x696   : > { %v1077_v21 = vsel %vm603_vm0, %v1074_v20, 0.0 }
 0x697   : > { %1078 = vadd.xlane.f32.xlu0 %v1077_v21 }
 0x699   : > { %v1072_v22 = vpop.f32.mrf.mxu2 }
 0x70a   : > { %v1079_v23 = vpop.xlane.xlu0 %1078 }
 0x70b   : > { %v1080_v24 = vmul.f32 %v1079_v23, %v954_v47 }
 0x70d   : > { %v1081_v25 = vsub.f32 %v1074_v20, %v1080_v24 }
 0x70f   : > { %v1082_v26 = vmul.f32 %v1081_v25, %v1081_v25 }
 0x711   : > { %v1083_v27 = vsel %vm603_vm0, %v1082_v26, 0.0 }
 0x712   : > { %1084 = vadd.xlane.f32.xlu2 %v1083_v27 }
 0x785   : > { %v1085_v28 = vpop.xlane.xlu2 %1084 }
 0x786   : > { %v1086_v29 = vmul.f32 %v1085_v28, %v954_v47 }
 0x788   : > { %v1087_v30 = vadd.f32 1e-05, %v1086_v29 }
 0x78a   : > { %1427 = vrsqrt.f32 %v1087_v30  ;;  %vm1094_vm12 = vweird.f32 %v1087_v30 }
 0x790   : > { %v1428_v31 = vpop.eup %1427 }
 0x791   : > { %v1089_v32 = vmul.f32 %v1428_v31, %v1087_v30  ;;  %vm1095_vm11 = vweird.f32 %v1428_v31 }
 0x792   : > { %vm1096_vm13 = vmor %vm1094_vm12, %vm1095_vm11 }
 0x793   : > { %v1090_v33 = vmul.f32 %v1428_v31, %v1089_v32 }
 0x795   : > { %v1091_v34 = vmul.f32 0.5, %v1090_v33 }
 0x797   : > { %v1092_v35 = vsub.f32 1.5, %v1091_v34 }
 0x799   : > { %v1093_v36 = vmul.f32 %v1428_v31, %v1092_v35 }
 0x79b   : > { %v1097_v38 = vsel %vm1096_vm13, %v1428_v31, %v1093_v36 }
 0x79c   : > { %v1098_v39 = vmul.f32 %v1097_v38, %v1081_v25 }
 0x79e   : > { %v1102_v41 = vmul.f32 %v1405_v37, %v1098_v39 }
 0x7a0   : > { %v1106_v42 = vadd.f32 %v1406_v40, %v1102_v41 }
 0x7a2   : > { %1107 = vst.msk [vmem:[%s575_s25] sm:$0xff] %vm603_vm0, %v1106_v42 }
 0x7a3   : > { %1546 = shalt.err (!%p1543_p11)
}
 0x7a4   : > { %1327 = dma.vmem_to_hbm [thread:$0]  (%p1757_p0), %s1122_s15, 128, %s1124_s24, %s1109_s17  }
 0x7a5 PF: > { %s2015_s12 = sld [smem:[#allocation14_spill]] }
 0x7a6   : > { %s2017_s29 = sld [smem:[#allocation16_spill]] }
 0x7ab   : > { %s1135_s20 = sand.u32 1, %s2015_s12  }
 0x7ac   : > { %p2018_p5 = scmp.ge.s32.totalorder %s2017_s29, 2  ;;  %s1136_s16 = scalar_lea.sflag [#allocation5], %s1135_s20 }
 0x7ae   : > { %p1341_p12 = pnand %p2018_p5, %p1765_p6 }
 0x7b0   : > { %p1342_p2 = pneg %p1341_p12 }
 0x7b2   : > { %1576 = dma.done.wait (%p1342_p2), %s1136_s16, 128  }
 0x7b3   : > { %1578 = vsyncadd (%p1342_p2), %s1136_s16, 4294967168  ;;  %s2019_s21 = sld [smem:[#allocation17_spill]]  ;;  %s2022_s18 = smov %s1585_s19 }
 0x7b4   : > { %s2020_s28 = sld [smem:[#allocation15_spill]] }
 0x7b5   : > { %s2021_s20 = sld [smem:[#allocation18_spill]] }
 0x7b9   : > { %p31_p4 = scmp.ge.s32.totalorder %s2019_s21, 4  }
 0x7ba   : > { %s2023_s19 = smov %s2020_s28 }
 0x7bb   :  { %33 = sbr.rel (!%p31_p4) target bundleno = 15 (0xf), region = 145 }
 0x7c0   :  { %1142 = vsyncpa [#allocation4], 1 }
 0x7c1   :  { %1144 = vsyncpa [#allocation4 + $0x1], 1 }
 0x7c2   :  { %1145 = vsyncpa [#allocation7], 1 }
 0x7c3   :  { %1147 = vsyncpa [#allocation7 + $0x1], 1 }
 0x7c4   :  { %1148 = vsyncpa [#allocation5], 1 }
 0x7c5   :  { %1150 = vsyncpa [#allocation5 + $0x1], 1 }

// kernel: tpu_custom_call.1
= control target key start
LH: loop header
LB: loop body
LE: loop exit
PB: predicated region body
PF: predicated region fallthrough
CT: control target
= control target key end

     0   :  { %s1962_s0 = inlined_call_operand.vmem [shape: f32[2,8,32], index: 0, kind: input, shape index: {}]   ;;  %s1963_s1 = inlined_call_operand.hbm [shape: bf16[2,8,8], index: 1, kind: input, shape index: {}]   ;;  %s1964_s2 = inlined_call_operand.hbm [shape: f32[2,1,8], index: 2, kind: input, shape index: {}]   ;;  %s1965_s3 = inlined_call_operand.vmem [shape: bf16[32,96], index: 3, kind: input, shape index: {}]   ;;  %s1966_s4 = inlined_call_operand.vmem [shape: f32[1,96], index: 4, kind: input, shape index: {}]   ;;  %s1967_s5 = inlined_call_operand.vmem [shape: bf16[32,32], index: 5, kind: input, shape index: {}]   ;;  %s1968_s6 = inlined_call_operand.vmem [shape: f32[1,32], index: 6, kind: input, shape index: {}]   ;;  %s1969_s7 = inlined_call_operand.vmem [shape: f32[1,32], index: 7, kind: input, shape index: {}]   ;;  %s1970_s8 = inlined_call_operand.vmem [shape: f32[1,32], index: 8, kind: input, shape index: {}]   ;;  %s1971_s9 = inlined_call_operand.hbm [shape: bf16[32,64], index: 9, kind: input, shape index: {}]   ;;  %s1972_s10 = inlined_call_operand.vmem [shape: f32[1,64], index: 10, kind: input, shape index: {}]   ;;  %s1973_s11 = inlined_call_operand.vmem [shape: bf16[64,32], index: 11, kind: input, shape index: {}]   ;;  %s1974_s12 = inlined_call_operand.vmem [shape: f32[1,32], index: 12, kind: input, shape index: {}]   ;;  %s1975_s13 = inlined_call_operand.vmem [shape: f32[1,32], index: 13, kind: input, shape index: {}]   ;;  %s1976_s14 = inlined_call_operand.vmem [shape: f32[1,32], index: 14, kind: input, shape index: {}]   ;;  %s1977_s15 = inlined_call_operand.hbm [shape: f32[2,8,32], index: 15, kind: output, shape index: {}]  }
   0x1   :  { %1987 = sst [smem:[#allocation21_spill]] %s1970_s8 }
   0x2   :  { %1988 = sst [smem:[#allocation22_spill]] %s1971_s9 }
   0x3   :  { %1989 = sst [smem:[#allocation23_spill]] %s1972_s10 }
   0x4   :  { %1990 = sst [smem:[#allocation24_spill]] %s1974_s12 }
   0x5   :  { %1991 = sst [smem:[#allocation25_spill]] %s1975_s13 }
   0x6   :  { %1992 = sst [smem:[#allocation26_spill]] %s1976_s14 }
   0x7   :  { %1993 = sst [smem:[#allocation27_spill]] %s1977_s15 }
   0x8   :  { %20 = vsyncpa [#allocation4], 0 }
   0x9   :  { %22 = vsyncpa [#allocation4 + $0x1], 0 }
   0xa   :  { %23 = vsyncpa [#allocation7], 0 }
   0xb   :  { %25 = vsyncpa [#allocation7 + $0x1], 0 }
   0xc   :  { %26 = vsyncpa [#allocation5], 0 }
   0xd   :  { %28 = vsyncpa [#allocation5 + $0x1], 0  ;;  %s1693_s18 = smov 0   ;;  %s1695_s19 = smov 0  }
   0xe   :  { %s1697_s20 = smov 0   ;;  %s1699_s21 = smov 0  }
   0xf LB: > { %1994 = sst [smem:[#allocation14_spill]] %s1581_s18  ;;  %s1717_s25 = sadd.s32 4294967295, %s1593_s21   ;;  %s1593_s21 = sphi %s1699_s21, %s2019_s21   ;;  %s1589_s20 = sphi %s1697_s20, %s2021_s20   ;;  %s1585_s19 = sphi %s1695_s19, %s2023_s19   ;;  %s1581_s18 = sphi %s1693_s18, %s2022_s18  }
  0x10   : > { %1995 = sst [smem:[#allocation15_spill]] %s1589_s20  ;;  %p1235_p0 = scmp.ge.s32.totalorder %s1593_s21, 1 }
  0x11   : > { %1996 = sst [smem:[#allocation16_spill]] %s1593_s21  ;;  %p81_p1 = scmp.eq.s32.totalorder %s1717_s25, 0 }
  0x12   : > { %s1997_s9 = sld [smem:[#allocation22_spill]]  ;;  %p395_p2 = scmp.lt.s32.totalorder %s1593_s21, 3 }
  0x13   : > { %s1595_s27 = smov [#allocation8]   ;;  %s1596_s29 = smov 64  }
  0x14   : > { %p1722_p3 = pnand %p1235_p0, %p395_p2  ;;  %s426_s28 = sshll.u32 %s1595_s27, 4  ;;  %s427_s28 = int_to_ptr.vmem [resolvable:$true] %s426_s28 }
  0x15   : > { %s1597_s30 = smov 4   ;;  %s1234_s16 = sadd.s32 4294967294, %s1593_s21  }
  0x16   : > { %p1329_p4 = pneg %p1722_p3  ;;  %s1733_s17 = sadd.s32 1, %s1593_s21  }
  0x17   : > { %1999 = sst [smem:[#allocation17_spill]] %s1733_s17  ;;  %s67_s22 = sadd.s32 1, %s1589_s20 }
  0x18   : > { %s424_s24 = sshll.u32 %s1997_s9, 4  ;;  %p1330_p6 = pnand %p1329_p4, %p81_p1  ;;  %s425_s24 = int_to_ptr.hbm [resolvable:$true] %s424_s24 }
  0x19   : > { %s64_s23 = ssub.s32 %s1593_s21, %s1733_s17  ;;  %p74_p7 = scmp.ne.s32.totalorder %s1589_s20, %s1585_s19 }
  0x1a   : > { %1332 = dma.hbm_to_vmem [thread:$0]  (!%p1330_p6), %s425_s24, 256, %s427_s28, [#allocation7], %s1596_s29, %s1596_s29, %s1597_s30  }
  0x1b   : > { %p65_p8 = scmp.eq.s32.totalorder %s64_s23, 0  ;;  %p75_p9 = scmp.eq.s32.totalorder %s1593_s21, 0 }
  0x1c   : > { %p80_p10 = scmp.ne.s32.totalorder %s1585_s19, %s1581_s18  ;;  %p382_p11 = scmp.eq.s32.totalorder %s1717_s25, 1 }
  0x1d   : > { %s1745_s27 = scalar_select %p65_p8, %s1589_s20, %s67_s22  }
  0x1e   : > { %p1747_p12 = por %p75_p9, %p74_p7  ;;  %p1753_p13 = por %p81_p1, %p80_p10 }
  0x1f   : > { %2000 = sst [smem:[#allocation18_spill]] %s1745_s27  ;;  %p1757_p0 = por %p382_p11, %p74_p7 }
  0x20   : > { %p388_p2 = scmp.eq.s32.totalorder %s1234_s16, 1  ;;  %p1345_p4 = scmp.lt.s32.totalorder %s1593_s21, 2 }
  0x21   : > { %s2003_s28 = scalar_select %p1757_p0, 1, 0 }
  0x22   : > { %s1763_s29 = sand.u32 1, %s1589_s20   ;;  %p1765_p6 = por %p388_p2, %p80_p10 }
  0x23   : > { %2004 = sst [smem:[#allocation19_spill]] %s2003_s28  ;;  %s1238_s22 = sshll.u32 %s1763_s29, 2 }
  0x24   : > { %s2005_s30 = scalar_select %p1765_p6, 1, 0 }
  0x25   : > { %s1239_s23 = sshll.u32 %s1593_s21, 2  ;;  %s466_s15 = scalar_lea.vmem [#allocation3], %s1238_s22 }
  0x26   : > { %2006 = sst [smem:[#allocation20_spill]] %s2005_s30  ;;  %s470_s18 = scalar_lea.hbm %s1963_s1, %s1239_s23 }
  0x27   : > { %s472_s14 = sshll.u32 %s470_s18, 4  ;;  %s474_s13 = sshll.u32 %s466_s15, 4  ;;  %s473_s14 = int_to_ptr.hbm [resolvable:$true] %s472_s14  ;;  %s475_s13 = int_to_ptr.vmem [resolvable:$true] %s474_s13 }
  0x28   : > { %p1776_p7 = pnand %p1345_p4, %p1747_p12  ;;  %s481_s20 = sand.u32 1, %s1593_s21  }
  0x29   : > { %s487_s12 = scalar_lea.hbm %s1964_s2, %s1593_s21  ;;  %s463_s10 = scalar_lea.sflag [#allocation4], %s1763_s29 }
  0x2a   : > { %s1459_s17 = sshra.s32 %s473_s14, 4  ;;  %p1463_p9 = pneg %p1776_p7  ;;  %s1460_s17 = int_to_ptr.hbm [resolvable:$true] %s1459_s17 }
  0x2b   : > { %s1461_s18 = scalar_lea.hbm %s1460_s17, 4  ;;  %s1466_s27 = scalar_lea.hbm %s1963_s1, 8 }
  0x2c   : > { %p1462_p8 = scmp.ne.s32.totalorder %s1460_s17, %s1461_s18  ;;  %p1467_p12 = scmp.lt.s32.totalorder %s1460_s17, %s1963_s1 }
  0x2d   : > { %p1468_p2 = scmp.lt.s32.totalorder %s1466_s27, %s1461_s18 }
  0x2e   : > { %p1464_p10 = pnand %p1463_p9, %p1462_p8 }
  0x2f   : > { %p1469_p4 = por %p1468_p2, %p1467_p12 }
  0x30   : > { %p1465_p11 = pneg %p1464_p10 }
  0x32   : > { %p1470_p5 = pnand %p1469_p4, %p1465_p11 }
  0x34   : > { %1473 = shalt.err (!%p1470_p5)
}
  0x35   : > { %1336 = dma.hbm_to_vmem [thread:$0]  (!%p1776_p7), %s473_s14, 64, %s475_s13, %s463_s10  }
  0x36   : > { %s489_s28 = sshll.u32 %s487_s12, 4  ;;  %s484_s30 = scalar_lea.vmem [#allocation6], %s1763_s29  ;;  %s490_s28 = int_to_ptr.hbm [resolvable:$true] %s489_s28 }
  0x37   : > { %s491_s21 = sshll.u32 %s484_s30, 4  ;;  %s482_s9 = scalar_lea.sflag [#allocation7], %s481_s20  ;;  %s492_s21 = int_to_ptr.vmem [resolvable:$true] %s491_s21 }
  0x38   : > { %s1489_s15 = sshra.s32 %s490_s28, 4  ;;  %s1496_s27 = scalar_lea.hbm %s1964_s2, 2  ;;  %s1490_s15 = int_to_ptr.hbm [resolvable:$true] %s1489_s15 }
  0x39   : > { %s1491_s8 = scalar_lea.hbm %s1490_s15, 1  ;;  %p1497_p5 = scmp.lt.s32.totalorder %s1490_s15, %s1964_s2 }
  0x3a   : > { %p1492_p8 = scmp.ne.s32.totalorder %s1490_s15, %s1491_s8  ;;  %p1498_p12 = scmp.lt.s32.totalorder %s1496_s27, %s1491_s8 }
  0x3c   : > { %p1494_p10 = pnand %p1492_p8, %p1463_p9  ;;  %p1499_p2 = por %p1498_p12, %p1497_p5 }
  0x3e   : > { %p1495_p11 = pneg %p1494_p10 }
  0x40   : > { %p1500_p4 = pnand %p1499_p2, %p1495_p11 }
  0x42   : > { %1503 = shalt.err (!%p1500_p4)
}
  0x43   : > { %1339 = dma.hbm_to_vmem [thread:$0]  (!%p1776_p7), %s490_s28, 16, %s492_s21, %s482_s9  }
  0x44   : > { %500 = sbr.rel (%p1722_p3) target bundleno = 1957 (0x7a5), region = 80  ;;  %s1814_s12 = sand.u32 (!%p1722_p3), 1, %s1585_s19  }
  0x45   : > { %s1241_s13 = sshll.u32 (!%p1722_p3), %s1814_s12, 2  ;;  %s503_s14 = scalar_lea.sflag (!%p1722_p3), [#allocation4], %s1814_s12 }
  0x46   : > { %s1818_s20 = scalar_lea.vmem (!%p1722_p3), [#allocation3], %s1241_s13 }
  0x49   : > { %1564 = dma.done.wait (%p1753_p13), %s503_s14, 64  }
  0x4a   : > { %1566 = vsyncadd (%p1753_p13), %s503_s14, 4294967232  ;;  %s512_s8 = sand.u32 1, %s1717_s25   ;;  %s515_s26 = scalar_lea.vmem [#allocation6], %s1814_s12 }
  0x4b   : > { %s513_s21 = scalar_lea.sflag [#allocation7], %s512_s8 }
  0x4c   : > { %1568 = dma.done.wait (%p1753_p13), %s513_s21, 16  }
  0x4d   : > { %1570 = vsyncadd (%p1753_p13), %s513_s21, 4294967280 }
  0x4e   : > { %1572 = dma.done.wait (%p81_p1), [#allocation7], 256  }
  0x4f   : > { %1574 = vsyncadd (%p81_p1), [#allocation7], 4294967040  ;;  %p576_p3 = scmp.lt.s32.totalorder %s1717_s25, 1  ;;  %v1310_v0 = vld [vmem:[%s1965_s3 + $0x8] sm:$0xff]  ;;  %v1309_v1 = vld [vmem:[%s1965_s3] sm:$0xff]  ;;  %vm603_vm0 = vcmask 261120  }
  0x50   : > { %613 = vmatpush.bf16.msra.mxu0 %v1310_v0  ;;  %v1398_v4 = vld [vmem:[%s1966_s4] ss:$0 sm:$0xff]  ;;  %s1598_s22 = smov 112   ;;  %s1599_s10 = smov 120   ;;  %vm629_vm1 = vcmask 64512   ;;  %vm676_vm2 = vcmask 1043456  }
  0x51   : > { %s577_s29 = scalar_select %p576_p3, %s1717_s25, 1  ;;  %v620_v15 = vld [vmem:[%s1818_s20] sm:$0xf]  ;;  %v1399_v19 = vld [vmem:[%s515_s26] ss:$0 sm:$0xff]  ;;  %vm762_vm3 = vcmask 130112  }
  0x52   : > { %s1600_s13 = smov 96   ;;  %s1601_s14 = smov 72   ;;  %v621_v16 = vunpack.c.l.bf16 %v620_v15  ;;  %vm832_vm4 = vcmask 195712   ;;  %vm902_vm5 = vcmask 261312   ;;  %vm1057_vm10 = vcmask 523264  }
  0x53   : > { %s1244_s16 = sshll.u32 %s577_s29, 3  ;;  %s1602_s8 = smov 80  }
  0x54   : > { %s579_s30 = scalar_lea.vmem %s1962_s0, %s1244_s16  ;;  %614 = vmatpush.bf16.msra.mxu0 %v1309_v1  ;;  %s1603_s21 = smov 88  }
  0x55   : > { %v1845_v2 = vld [vmem:[%s579_s30] sm:$0xff]  ;;  %s1604_s29 = smov 104   ;;  %s1605_s20 = smov 64  }
  0x56   : > { %v582_v3 = vpack.c.bf16 %v1845_v2, %v1845_v2  ;;  %s1606_s26 = smov 40   ;;  %s1607_s16 = smov 48  }
  0x57   : > { %s1608_s23 = smov 56   ;;  %s1609_s28 = smov 24  }
  0x58   : > { %1253 = vmatmul.msk.bf16.vlgmr.msra.gmra.mxu0 %vm603_vm0, %v582_v3  ;;  %s1610_s30 = smov 16   ;;  %s1611_s9 = smov 8  }
  0x59   : > { %s2009_s17 = sld [smem:[#allocation23_spill]] }
  0xd5   : > { %v616_v5 = vpop.f32.mrf.mxu0 }
  0xd6   : > { %v617_v6 = vadd.f32 %v1398_v4, %v616_v5 }
  0xd8   : > { %764 = vrot.lane.b32.xlu2 %v617_v6, %s1598_s22  ;;  %694 = vrot.lane.b32.xlu1 %v617_v6, %s1599_s10  ;;  %v669_v38 = vpack.c.bf16 %v617_v6, %v617_v6  ;;  %s2010_s22 = sld [smem:[#allocation24_spill]]  ;;  %s1243_s10 = sshll.u32 %s1814_s12, 3 }
  0xd9   : > { %627 = vrot.lane.b32.xlu0 %v617_v6, %s1600_s13  ;;  %s1306_s13 = sshll.u32 %s1717_s25, 3  ;;  %s575_s25 = scalar_lea.vmem [#allocation9], %s1243_s10 }
  0xda   : > { %s1121_s15 = sshll.u32 %s575_s25, 4  ;;  %s1122_s15 = int_to_ptr.vmem [resolvable:$true] %s1121_s15 }
  0xdd   : > { %v618_v7 = vpop.f32.mrf.mxu0 }
  0xe0   : > { %836 = vrot.lane.b32.xlu2 %v617_v6, %s1601_s14  ;;  %766 = vrot.lane.b32.xlu1 %v617_v6, %s1602_s8 }
  0xe1   : > { %696 = vrot.lane.b32.xlu0 %v617_v6, %s1603_s21  ;;  %s2011_s21 = sld [smem:[#allocation25_spill]] }
  0xe9   : > { %834 = vrot.lane.b32.xlu0 %v617_v6, %s1604_s29 }
 0x132   : > { %v765_v10 = vpop.permute.xlu2 %764 }
 0x13a   : > { %v837_v13 = vpop.permute.xlu2 %836 }
 0x14a   : > { %v695_v8 = vpop.permute.xlu1 %694 }
 0x14b   : > { %v628_v9 = vpop.permute.xlu0 %627 }
 0x14c   : > { %1254 = vmatpush.xpose.msk.msra.mxu1 %vm629_vm1, %v628_v9 }
 0x14f   : > { %1255 = vmatmul.msk.f32.vlgmr.msra.gmra.mxu1 %vm629_vm1, %v617_v6 }
 0x152   : > { %v767_v11 = vpop.permute.xlu1 %766 }
 0x153   : > { %v697_v12 = vpop.permute.xlu0 %696 }
 0x154   : > { %1258 = vmatpush.xpose.msk.msra.mxu3 %vm629_vm1, %v697_v12 }
 0x157   : > { %1259 = vmatmul.msk.f32.vlgmr.msra.gmra.mxu3 %vm629_vm1, %v695_v8 }
 0x158   : > { %1262 = vmatpush.xpose.msk.msrb.mxu3 %vm629_vm1, %v767_v11 }
 0x15b   : > { %v835_v14 = vpop.permute.xlu0 %834 }
 0x15c   : > { %1266 = vmatpush.xpose.msk.msra.mxu3 %vm629_vm1, %v837_v13 }
 0x15f   : > { %1263 = vmatmul.msk.f32.vlgmr.msrb.gmra.mxu3 %vm629_vm1, %v765_v10 }
 0x167   : > { %1267 = vmatmul.msk.f32.vlgmr.msra.gmra.mxu3 %vm629_vm1, %v835_v14 }
 0x1cc   : > { %v651_v17 = vpop.f32.mrf.mxu1 }
 0x1cd   : > { %v652_v18 = vadd.f32 %v651_v17, %v621_v16 }
 0x1cf   : > { %v1256_v20 = vclamps-f32 %v652_v18, 10.0 }
 0x1d1   : > { %v656_v21 = vadd.f32 %v1399_v19, %v1256_v20 }
 0x1d3   : > { %v657_v22 = vsel %vm629_vm1, %v656_v21, -inf }
 0x1d4   : > { %658 = vmax.xlane.f32.xlu1 %v657_v22 }
 0x1da   : > { %v719_v23 = vpop.f32.mrf.mxu3 }
 0x1db   : > { %v720_v24 = vadd.f32 %v719_v23, %v621_v16 }
 0x1dd   : > { %v1260_v25 = vclamps-f32 %v720_v24, 10.0 }
 0x1df   : > { %v724_v26 = vadd.f32 %v1399_v19, %v1260_v25 }
 0x1e1   : > { %v725_v27 = vsel %vm629_vm1, %v724_v26, -inf }
 0x1e2   : > { %v789_v28 = vpop.f32.mrf.mxu3  ;;  %726 = vmax.xlane.f32.xlu0 %v725_v27 }
 0x1e3   : > { %v790_v29 = vadd.f32 %v789_v28, %v621_v16  ;;  %v1312_v28 = vld [vmem:[%s1967_s5 + $0x8] sm:$0xff] }
 0x1e5   : > { %v1264_v30 = vclamps-f32 %v790_v29, 10.0  ;;  %v1311_v29 = vld [vmem:[%s1967_s5] sm:$0xff] }
 0x1e7   : > { %v794_v31 = vadd.f32 %v1399_v19, %v1264_v30 }
 0x1e9   : > { %v795_v32 = vsel %vm629_vm1, %v794_v31, -inf }
 0x1ea   : > { %796 = vmax.xlane.f32.xlu2 %v795_v32  ;;  %v859_v33 = vpop.f32.mrf.mxu3 }
 0x1eb   : > { %v860_v34 = vadd.f32 %v859_v33, %v621_v16 }
 0x1ed   : > { %v1268_v35 = vclamps-f32 %v860_v34, 10.0 }
 0x1ef   : > { %v864_v36 = vadd.f32 %v1399_v19, %v1268_v35  ;;  %v1400_v35 = vld [vmem:[%s1968_s6] ss:$0 sm:$0xff] }
 0x1f1   : > { %v865_v37 = vsel %vm629_vm1, %v864_v36, -inf }
 0x1f2   : > { %866 = vmax.xlane.f32.xlu2 %v865_v37 }
 0x20a   : > { %671 = vrot.lane.b32.xlu2 %v669_v38, %s1605_s20 }
 0x212   : > { %877 = vrot.lane.b32.xlu2 %v669_v38, %s1606_s26  ;;  %s2012_s26 = sld [smem:[#allocation27_spill]] }
 0x218   : > { %s1539_s10 = scalar_lea.hbm %s2012_s26, 16 }
 0x247   : > { %v659_v39 = vpop.xlane.xlu1 %658 }
 0x248   : > { %v660_v40 = vsub.f32 %v656_v21, %v659_v39 }
 0x24a   : > { %v661_v41 = vmul.f32 1.442695, %v660_v40 }
 0x24c   : > { %1407 = vpow2.f32 %v661_v41  ;;  %v1612_v41 = vmov 32.0  }
 0x252   : > { %v1408_v42 = vpop.eup %1407 }
 0x253   : > { %v663_v43 = vsel %vm629_vm1, %v1408_v42, 0.0 }
 0x254   : > { %664 = vadd.xlane.f32.xlu1 %v663_v43 }
 0x255   : > { %v727_v44 = vpop.xlane.xlu0 %726 }
 0x256   : > { %v728_v45 = vsub.f32 %v724_v26, %v727_v44 }
 0x258   : > { %v729_v46 = vmul.f32 1.442695, %v728_v45 }
 0x25a   : > { %1409 = vpow2.f32 %v729_v46 }
 0x25d   : > { %v797_v47 = vpop.xlane.xlu2 %796 }
 0x25e   : > { %v798_v48 = vsub.f32 %v794_v31, %v797_v47 }
 0x260   : > { %v1410_v49 = vpop.eup %1409  ;;  %v799_v50 = vmul.f32 1.442695, %v798_v48 }
 0x261   : > { %v731_v51 = vsel %vm629_vm1, %v1410_v49, 0.0 }
 0x262   : > { %1411 = vpow2.f32 %v799_v50  ;;  %732 = vadd.xlane.f32.xlu1 %v731_v51 }
 0x265   : > { %v867_v52 = vpop.xlane.xlu2 %866 }
 0x266   : > { %v868_v53 = vsub.f32 %v864_v36, %v867_v52 }
 0x268   : > { %v1412_v54 = vpop.eup %1411  ;;  %v869_v55 = vmul.f32 1.442695, %v868_v53  ;;  %v1313_v53 = vld [vmem:[#allocation8] sm:$0xff] }
 0x269   : > { %v801_v56 = vsel %vm629_vm1, %v1412_v54, 0.0 }
 0x26a   : > { %1413 = vpow2.f32 %v869_v55  ;;  %802 = vadd.xlane.f32.xlu0 %v801_v56 }
 0x26d   : > { %v672_v57 = vpop.permute.xlu2 %671 }
 0x26e   : > { %v678_v58 = vsel %vm676_vm2, %v672_v57, 0  ;;  %v1317_v57 = vld [vmem:[%s1973_s11 + $0x10] sm:$0xff] }
 0x26f   : > { %687 = vmatpush.bf16.msra.mxu2 %v678_v58 }
 0x270   : > { %v1414_v59 = vpop.eup %1413 }
 0x271   : > { %v871_v60 = vsel %vm629_vm1, %v1414_v59, 0.0 }
 0x272   : > { %872 = vadd.xlane.f32.xlu0 %v871_v60 }
 0x275   : > { %v878_v61 = vpop.permute.xlu2 %877 }
 0x276   : > { %v883_v62 = vsel %vm676_vm2, %v878_v61, 0 }
 0x277   : > { %892 = vmatpush.bf16.msrb.mxu0 %v883_v62 }
 0x27b   : > { %807 = vrot.lane.b32.xlu1 %v669_v38, %s1607_s16  ;;  %s2008_s16 = sld [smem:[#allocation21_spill]] }
 0x286   : > { %737 = vrot.lane.b32.xlu0 %v669_v38, %s1608_s23 }
 0x2c7   : > { %v665_v63 = vpop.xlane.xlu1 %664 }
 0x2c8   : > { %1415 = vrcp.f32 %v665_v63 }
 0x2ce   : > { %v1416_v0 = vpop.eup %1415 }
 0x2cf   : > { %v667_v1 = vmul.f32 %v1416_v0, %v1408_v42 }
 0x2d1   : > { %v668_v3 = vpack.c.bf16 %v667_v1, %v667_v1  ;;  %v1401_v1 = vld [vmem:[%s1969_s7] ss:$0 sm:$0xff] }
 0x2d3   : > { %1257 = vmatmul.msk.bf16.vlgmr.msra.gmra.mxu2 %vm629_vm1, %v668_v3 }
 0x2d5   : > { %v733_v5 = vpop.xlane.xlu1 %732 }
 0x2dd   : > { %v803_v4 = vpop.xlane.xlu0 %802 }
 0x2de   : > { %1417 = vrcp.f32 %v803_v4  ;;  %v1402_v4 = vld [vmem:[%s2008_s16] ss:$0 sm:$0xff]  ;;  %s1119_s16 = scalar_lea.hbm %s2012_s26, %s1306_s13 }
 0x2df   : > { %s1123_s24 = sshll.u32 %s1119_s16, 4  ;;  %s1124_s24 = int_to_ptr.hbm [resolvable:$true] %s1123_s24 }
 0x2e0   : > { %s1533_s18 = sshra.s32 %s1124_s24, 4  ;;  %s1534_s18 = int_to_ptr.hbm [resolvable:$true] %s1533_s18 }
 0x2e1   : > { %s1535_s27 = scalar_lea.hbm %s1534_s18, 8  ;;  %p1540_p9 = scmp.lt.s32.totalorder %s1534_s18, %s2012_s26 }
 0x2e2   : > { %p1536_p1 = scmp.ne.s32.totalorder %s1534_s18, %s1535_s27  ;;  %p1541_p8 = scmp.lt.s32.totalorder %s1539_s10, %s1535_s27 }
 0x2e4   : > { %v1418_v7 = vpop.eup %1417  ;;  %p1537_p13 = pnand %p1536_p1, %p1757_p0  ;;  %p1542_p10 = por %p1541_p8, %p1540_p9 }
 0x2e5   : > { %v873_v6 = vpop.xlane.xlu0 %872  ;;  %v805_v9 = vmul.f32 %v1418_v7, %v1412_v54  ;;  %v1318_v54 = vld [vmem:[%s1973_s11 + $0x18] sm:$0xff] }
 0x2e6   : > { %1419 = vrcp.f32 %v873_v6  ;;  %p1538_p7 = pneg %p1537_p13 }
 0x2e7   : > { %1421 = vrcp.f32 %v733_v5  ;;  %v806_v14 = vpack.c.bf16 %v805_v9, %v805_v9  ;;  %v1316_v9 = vld [vmem:[%s1973_s11 + $0x8] sm:$0xff] }
 0x2e8   : > { %1423 = vrcp.f32 %v1612_v41  ;;  %p1543_p11 = pnand %p1542_p10, %p1538_p7 }
 0x2ec   : > { %v1420_v8 = vpop.eup %1419 }
 0x2ed   : > { %v875_v10 = vmul.f32 %v1420_v8, %v1414_v59  ;;  %v808_v11 = vpop.permute.xlu1 %807  ;;  %v1422_v15 = vpop.eup %1421 }
 0x2ee   : > { %v813_v12 = vsel %vm676_vm2, %v808_v11, 0  ;;  %v735_v16 = vmul.f32 %v1422_v15, %v1410_v49  ;;  %v1424_v42 = vpop.eup %1423  ;;  %v1403_v11 = vld [vmem:[%s2009_s17] ss:$0 sm:$0xff]  ;;  %s1109_s17 = scalar_lea.sflag [#allocation5], %s1814_s12 }
 0x2ef   : > { %822 = vmatpush.bf16.msrb.mxu2 %v813_v12  ;;  %v876_v13 = vpack.c.bf16 %v875_v10, %v875_v10  ;;  %v949_v43 = vmul.f32 32.0, %v1424_v42  ;;  %vm953_vm6 = vweird.f32 %v1424_v42  ;;  %v1315_v10 = vld [vmem:[%s1973_s11] sm:$0xff] }
 0x2f0   : > { %v736_v19 = vpack.c.bf16 %v735_v16, %v735_v16 }
 0x2f1   : > { %1269 = vmatmul.msk.bf16.vlgmr.msrb.gmra.mxu0 %vm629_vm1, %v876_v13  ;;  %v950_v44 = vsub.f32 1.0, %v949_v43 }
 0x2f2   : > { %1265 = vmatmul.msk.bf16.vlgmr.msrb.gmra.mxu2 %vm629_vm1, %v806_v14 }
 0x2f3   : > { %v951_v45 = vmul.f32 %v1424_v42, %v950_v44  ;;  %1065 = vmatpush.bf16.msra.mxu2 %v1318_v54 }
 0x2f5   : > { %v952_v46 = vadd.f32 %v1424_v42, %v951_v45 }
 0x2f7   : > { %v954_v47 = vsel %vm953_vm6, %v1424_v42, %v952_v46  ;;  %1066 = vmatpush.bf16.msra.mxu2 %v1317_v57 }
 0x2f8   : > { %v738_v17 = vpop.permute.xlu0 %737 }
 0x2f9   : > { %v743_v18 = vsel %vm676_vm2, %v738_v17, 0  ;;  %v1404_v17 = vld [vmem:[%s2010_s22] ss:$0 sm:$0xff] }
 0x2fa   : > { %752 = vmatpush.bf16.msrb.mxu1 %v743_v18 }
 0x2fb   : > { %1067 = vmatpush.bf16.msra.mxu2 %v1316_v9 }
 0x2fd   : > { %1261 = vmatmul.msk.bf16.vlgmr.msrb.gmra.mxu1 %vm629_vm1, %v736_v19 }
 0x2fe   : > { %935 = vmatpush.bf16.msra.mxu1 %v1312_v28 }
 0x2ff   : > { %1068 = vmatpush.bf16.msra.mxu2 %v1315_v10 }
 0x302   : > { %936 = vmatpush.bf16.msra.mxu1 %v1311_v29 }
 0x356   : > { %v689_v20 = vpop.f32.mrf.mxu2 }
 0x357   : > { %693 = vst.msk [vmem:[#allocation2] sm:$0xff] %vm629_vm1, %v689_v20 }
 0x35e   : > { %v691_v21 = vpop.f32.mrf.mxu2 }
 0x36e   : > { %v894_v22 = vpop.f32.mrf.mxu0 }
 0x36f   : > { %899 = vrot.lane.b32.xlu0 %v894_v22, %s1609_s28 }
 0x375   : > { %v824_v23 = vpop.f32.mrf.mxu2 }
 0x376   : > { %829 = vrot.lane.b32.xlu1 %v824_v23, %s1610_s30  ;;  %v896_v24 = vpop.f32.mrf.mxu0 }
 0x37a   : > { %v754_v25 = vpop.f32.mrf.mxu1 }
 0x37b   : > { %759 = vrot.lane.b32.xlu2 %v754_v25, %s1611_s9  ;;  %s2014_s9 = sld [smem:[#allocation26_spill]] }
 0x37d   : > { %v826_v26 = vpop.f32.mrf.mxu2 }
 0x382   : > { %v756_v27 = vpop.f32.mrf.mxu1 }
 0x3d5   : > { %v760_v30 = vpop.permute.xlu2 %759 }
 0x3d6   : > { %763 = vst.msk [vmem:[#allocation2] sm:$0xff] %vm762_vm3, %v760_v30 }
 0x3e1   : > { %v900_v32 = vpop.permute.xlu0 %899 }
 0x3e8   : > { %v830_v31 = vpop.permute.xlu1 %829 }
 0x3e9   : > { %833 = vst.msk [vmem:[#allocation2] sm:$0xff] %vm832_vm4, %v830_v31 }
 0x3ea   : > { %903 = vst.msk [vmem:[#allocation2] sm:$0xff] %vm902_vm5, %v900_v32 }
 0x3f1   : > { %v904_v33 = vld [vmem:[#allocation2] sm:$0xff] }
 0x3f2   : > { %v905_v34 = vpack.c.bf16 %v904_v33, %v904_v33 }
 0x3f4   : > { %1278 = vmatmul.msk.bf16.vlgmr.msra.gmra.mxu1 %vm603_vm0, %v905_v34 }
 0x471   : > { %v938_v36 = vpop.f32.mrf.mxu1 }
 0x472   : > { %v939_v37 = vadd.f32 %v1400_v35, %v938_v36 }
 0x474   : > { %v942_v38 = vadd.f32 %v939_v37, %v1845_v2  ;;  %v1314_v2 = vld [vmem:[#allocation8 + $0x8] sm:$0xff] }
 0x475   : > { %1012 = vmatpush.bf16.msrb.mxu3 %v1314_v2  ;;  %v1405_v37 = vld [vmem:[%s2011_s21] ss:$0 sm:$0xff] }
 0x476   : > { %v945_v39 = vsel %vm603_vm0, %v942_v38, 0.0 }
 0x477   : > { %946 = vadd.xlane.f32.xlu2 %v945_v39 }
 0x479   : > { %v940_v40 = vpop.f32.mrf.mxu1  ;;  %1013 = vmatpush.bf16.msrb.mxu3 %v1313_v53 }
 0x47a   : > { %v1406_v40 = vld [vmem:[%s2014_s9] ss:$0 sm:$0xff] }
 0x4ea   : > { %v947_v48 = vpop.xlane.xlu2 %946 }
 0x4eb   : > { %v955_v49 = vmul.f32 %v954_v47, %v947_v48 }
 0x4ed   : > { %v956_v50 = vsub.f32 %v942_v38, %v955_v49 }
 0x4ef   : > { %v957_v51 = vmul.f32 %v956_v50, %v956_v50 }
 0x4f1   : > { %v958_v52 = vsel %vm603_vm0, %v957_v51, 0.0 }
 0x4f2   : > { %959 = vadd.xlane.f32.xlu1 %v958_v52 }
 0x565   : > { %v960_v55 = vpop.xlane.xlu1 %959 }
 0x566   : > { %v961_v56 = vmul.f32 %v960_v55, %v954_v47 }
 0x568   : > { %v962_v58 = vadd.f32 1e-05, %v961_v56 }
 0x56a   : > { %1425 = vrsqrt.f32 %v962_v58  ;;  %vm969_vm8 = vweird.f32 %v962_v58 }
 0x570   : > { %v1426_v59 = vpop.eup %1425 }
 0x571   : > { %v964_v60 = vmul.f32 %v1426_v59, %v962_v58  ;;  %vm970_vm7 = vweird.f32 %v1426_v59 }
 0x572   : > { %vm971_vm9 = vmor %vm969_vm8, %vm970_vm7 }
 0x573   : > { %v965_v61 = vmul.f32 %v1426_v59, %v964_v60 }
 0x575   : > { %v966_v62 = vmul.f32 0.5, %v965_v61 }
 0x577   : > { %v967_v63 = vsub.f32 1.5, %v966_v62 }
 0x579   : > { %v968_v0 = vmul.f32 %v1426_v59, %v967_v63 }
 0x57b   : > { %v972_v3 = vsel %vm971_vm9, %v1426_v59, %v968_v0 }
 0x57c   : > { %v973_v5 = vmul.f32 %v972_v3, %v956_v50 }
 0x57e   : > { %v977_v6 = vmul.f32 %v1401_v1, %v973_v5 }
 0x580   : > { %v981_v7 = vadd.f32 %v1402_v4, %v977_v6 }
 0x582   : > { %v982_v8 = vpack.c.bf16 %v981_v7, %v981_v7 }
 0x584   : > { %1287 = vmatmul.msk.bf16.vlgmr.msrb.gmra.mxu3 %vm603_vm0, %v982_v8 }
 0x607   : > { %v1015_v12 = vpop.f32.mrf.mxu3 }
 0x608   : > { %v1016_v13 = vadd.f32 %v1403_v11, %v1015_v12 }
 0x60a   : > { %v1019_v14 = vmax.f32 %v1016_v13, 0.0 }
 0x60c   : > { %v1020_v15 = vpack.c.bf16 %v1019_v14, %v1019_v14 }
 0x60e   : > { %1304 = vmatmul.msk.bf16.vlgmr.msra.gmra.mxu2 %vm1057_vm10, %v1020_v15 }
 0x60f   : > { %v1017_v16 = vpop.f32.mrf.mxu3 }
 0x691   : > { %v1070_v18 = vpop.f32.mrf.mxu2 }
 0x692   : > { %v1071_v19 = vadd.f32 %v1404_v17, %v1070_v18 }
 0x694   : > { %v1074_v20 = vadd.f32 %v1071_v19, %v981_v7 }
 0x696   : > { %v1077_v21 = vsel %vm603_vm0, %v1074_v20, 0.0 }
 0x697   : > { %1078 = vadd.xlane.f32.xlu0 %v1077_v21 }
 0x699   : > { %v1072_v22 = vpop.f32.mrf.mxu2 }
 0x70a   : > { %v1079_v23 = vpop.xlane.xlu0 %1078 }
 0x70b   : > { %v1080_v24 = vmul.f32 %v1079_v23, %v954_v47 }
 0x70d   : > { %v1081_v25 = vsub.f32 %v1074_v20, %v1080_v24 }
 0x70f   : > { %v1082_v26 = vmul.f32 %v1081_v25, %v1081_v25 }
 0x711   : > { %v1083_v27 = vsel %vm603_vm0, %v1082_v26, 0.0 }
 0x712   : > { %1084 = vadd.xlane.f32.xlu2 %v1083_v27 }
 0x785   : > { %v1085_v28 = vpop.xlane.xlu2 %1084 }
 0x786   : > { %v1086_v29 = vmul.f32 %v1085_v28, %v954_v47 }
 0x788   : > { %v1087_v30 = vadd.f32 1e-05, %v1086_v29 }
 0x78a   : > { %1427 = vrsqrt.f32 %v1087_v30  ;;  %vm1094_vm12 = vweird.f32 %v1087_v30 }
 0x790   : > { %v1428_v31 = vpop.eup %1427 }
 0x791   : > { %v1089_v32 = vmul.f32 %v1428_v31, %v1087_v30  ;;  %vm1095_vm11 = vweird.f32 %v1428_v31 }
 0x792   : > { %vm1096_vm13 = vmor %vm1094_vm12, %vm1095_vm11 }
 0x793   : > { %v1090_v33 = vmul.f32 %v1428_v31, %v1089_v32 }
 0x795   : > { %v1091_v34 = vmul.f32 0.5, %v1090_v33 }
 0x797   : > { %v1092_v35 = vsub.f32 1.5, %v1091_v34 }
 0x799   : > { %v1093_v36 = vmul.f32 %v1428_v31, %v1092_v35 }
 0x79b   : > { %v1097_v38 = vsel %vm1096_vm13, %v1428_v31, %v1093_v36 }
 0x79c   : > { %v1098_v39 = vmul.f32 %v1097_v38, %v1081_v25 }
 0x79e   : > { %v1102_v41 = vmul.f32 %v1405_v37, %v1098_v39 }
 0x7a0   : > { %v1106_v42 = vadd.f32 %v1406_v40, %v1102_v41 }
 0x7a2   : > { %1107 = vst.msk [vmem:[%s575_s25] sm:$0xff] %vm603_vm0, %v1106_v42 }
 0x7a3   : > { %1546 = shalt.err (!%p1543_p11)
}
 0x7a4   : > { %1327 = dma.vmem_to_hbm [thread:$0]  (%p1757_p0), %s1122_s15, 128, %s1124_s24, %s1109_s17  }
 0x7a5 PF: > { %s2015_s12 = sld [smem:[#allocation14_spill]] }
 0x7a6   : > { %s2017_s29 = sld [smem:[#allocation16_spill]] }
 0x7ab   : > { %s1135_s20 = sand.u32 1, %s2015_s12  }
 0x7ac   : > { %p2018_p5 = scmp.ge.s32.totalorder %s2017_s29, 2  ;;  %s1136_s16 = scalar_lea.sflag [#allocation5], %s1135_s20 }
 0x7ae   : > { %p1341_p12 = pnand %p2018_p5, %p1765_p6 }
 0x7b0   : > { %p1342_p2 = pneg %p1341_p12 }
 0x7b2   : > { %1576 = dma.done.wait (%p1342_p2), %s1136_s16, 128  }
 0x7b3   : > { %1578 = vsyncadd (%p1342_p2), %s1136_s16, 4294967168  ;;  %s2019_s21 = sld [smem:[#allocation17_spill]]  ;;  %s2022_s18 = smov %s1585_s19 }
 0x7b4   : > { %s2020_s28 = sld [smem:[#allocation15_spill]] }
 0x7b5   : > { %s2021_s20 = sld [smem:[#allocation18_spill]] }
 0x7b9   : > { %p31_p4 = scmp.ge.s32.totalorder %s2019_s21, 4  }
 0x7ba   : > { %s2023_s19 = smov %s2020_s28 }
 0x7bb   :  { %33 = sbr.rel (!%p31_p4) target bundleno = 15 (0xf), region = 145 }
 0x7c0   :  { %1142 = vsyncpa [#allocation4], 1 }
 0x7c1   :  { %1144 = vsyncpa [#allocation4 + $0x1], 1 }
 0x7c2   :  { %1145 = vsyncpa [#allocation7], 1 }
 0x7c3   :  { %1147 = vsyncpa [#allocation7 + $0x1], 1 }
 0x7c4   :  { %1148 = vsyncpa [#allocation5], 1 }
 0x7c5   :  { %1150 = vsyncpa [#allocation5 + $0x1], 1 }

</bundles_post_ra>
